<compile_context>
chip_gen: v7x
topology: tpu7x:2x2x1
jax: 0.10.0
libtpu: 0.0.40
codegen_flags: <defaults>
</compile_context>

<pallas_src>
import functools

import jax
import jax.numpy as jnp
import numpy as np
from jax.experimental import pallas as pl
from jax.experimental.pallas import tpu as pltpu


def _round_up(x, m):
    return (x + m - 1) // m * m


# ----------------------------------------------------------------------------
# Pass 1: 3x3 conv as 9 shifted-window matmuls on the flattened padded image
#         (bf16 MXU inputs, f32 accumulation) + per-image BN partial statistics.
# ----------------------------------------------------------------------------
def _make_conv_stats_kernel(HWp, Wp, Coutp):
    def kernel(xflat_ref, w_ref, mask_ref, y_ref, stats_ref):
        # xflat_ref: (1, FLATP, Cin)  bf16  zero-padded, spatially-flattened image
        # w_ref:     (9, Cin, Coutp)  bf16  per-tap weights (Cout zero-padded to 128)
        # mask_ref:  (HWp, 1)         f32   1.0 on valid output columns, else 0.0
        # y_ref:     (1, HWp, Coutp)  f32   conv output (pre-BN), incl. 2 junk cols/row
        # stats_ref: (1, 2, Coutp)    f32   [sum, sum_sq] over this image's valid pixels
        acc = jnp.zeros((HWp, Coutp), jnp.float32)
        for t in range(9):
            kh, kw = divmod(t, 3)
            xs = xflat_ref[0, pl.ds(kh * Wp + kw, HWp), :]          # (HWp, Cin) bf16
            acc = acc + jnp.dot(xs, w_ref[t], preferred_element_type=jnp.float32)
        y_ref[0] = acc
        yv = acc * mask_ref[...]                                    # zero junk columns
        stats_ref[0, 0:1, :] = jnp.sum(yv, axis=0, keepdims=True)
        stats_ref[0, 1:2, :] = jnp.sum(yv * yv, axis=0, keepdims=True)

    return kernel


# ----------------------------------------------------------------------------
# Pass 2a: fused BN(scale, shift) + ReLU + 2x2 max-pool epilogue.
#   y is viewed as (N, H, Wp//2, 2*Coutp): adjacent output columns are packed in
#   the lane dim, so horizontal pooling is a lane-aligned slice + max; vertical
#   pooling comes from the 2-row input block selected by the grid.
# ----------------------------------------------------------------------------
def _make_bn_relu_pool_kernel(Coutp, Wo):
    def kernel(y_ref, scale_ref, shift_ref, o_ref):
        sc = scale_ref[...]                                         # (1, 2*Coutp)
        sh = shift_ref[...]
        z0 = jnp.maximum(y_ref[0, 0] * sc + sh, 0.0)                # (Wpair, 2*Coutp)
        z1 = jnp.maximum(y_ref[0, 1] * sc + sh, 0.0)
        zv = jnp.maximum(z0, z1)                                    # vertical max
        zh = jnp.maximum(zv[:, :Coutp], zv[:, Coutp:])              # horizontal max
        o_ref[0, 0] = zh[:Wo, :]

    return kernel


# ----------------------------------------------------------------------------
# Pass 2b: fused BN(scale, shift) + ReLU (no pooling).
# ----------------------------------------------------------------------------
def _make_bn_relu_kernel(TH, W, Coutp):
    def kernel(y_ref, scale_ref, shift_ref, o_ref):
        sc = scale_ref[...]                                         # (1, Coutp)
        sh = shift_ref[...]
        for r in range(TH):
            z = jnp.maximum(y_ref[0, r] * sc + sh, 0.0)             # (Wp, Coutp)
            o_ref[0, r] = z[:W, :]

    return kernel


@functools.partial(jax.jit, static_argnames=("pool",))
def conv_block(x_nchw, conv_w_hwio, conv_b, bn_gamma, bn_beta, *, pool=False):
    """ConvBlock forward: Conv2d(3x3, pad=1) -> BatchNorm2d(batch stats) -> ReLU
    [-> MaxPool2d(2)]. Input/output are NCHW float32 (PyTorch convention)."""
    del conv_b  # exactly cancelled by the train-mode BN mean subtraction

    N, Cin, H, W = x_nchw.shape
    KH, KW, Cin_w, Cout = conv_w_hwio.shape
    assert (KH, KW) == (3, 3) and Cin_w == Cin, "kernel assumes 3x3 conv, padding=1"
    if pool:
        assert H % 2 == 0 and W % 2 == 0, "2x2 max-pool needs even spatial dims"

    eps = 1e-5
    Hp, Wp = H + 2, W + 2
    HWp = H * Wp
    Coutp = _round_up(Cout, 128)              # lane-dense channel dim
    FLATP = _round_up(Hp * Wp + 2, 8)         # flattened padded image + tap halo rows
    vmem_limit = 32 * 1024 * 1024             # safe on v5e/v6e/v7x

    # ---- layout prep (pure XLA glue; no 9x im2col blow-up in HBM) ----
    xb = jnp.transpose(x_nchw, (0, 2, 3, 1)).astype(jnp.bfloat16)       # NHWC bf16
    xpad = jnp.pad(xb, ((0, 0), (1, 1), (1, 1), (0, 0)))                # (N,Hp,Wp,Cin)
    xflat = xpad.reshape(N, Hp * Wp, Cin)
    xflat = jnp.pad(xflat, ((0, 0), (0, FLATP - Hp * Wp), (0, 0)))
    w = conv_w_hwio.astype(jnp.bfloat16).reshape(KH * KW, Cin, Cout)
    w = jnp.pad(w, ((0, 0), (0, 0), (0, Coutp - Cout)))
    col_in_row = np.arange(HWp, dtype=np.int32) % Wp
    mask = jnp.asarray((col_in_row < W).astype(np.float32)).reshape(HWp, 1)

    # ---- pass 1: conv + per-image partial BN stats ----
    y, stats = pl.pallas_call(
        _make_conv_stats_kernel(HWp, Wp, Coutp),
        grid=(N,),
        in_specs=[
            pl.BlockSpec((1, FLATP, Cin), lambda n: (n, 0, 0)),
            pl.BlockSpec((KH * KW, Cin, Coutp), lambda n: (0, 0, 0)),
            pl.BlockSpec((HWp, 1), lambda n: (0, 0)),
        ],
        out_specs=[
            pl.BlockSpec((1, HWp, Coutp), lambda n: (n, 0, 0)),
            pl.BlockSpec((1, 2, Coutp), lambda n: (n, 0, 0)),
        ],
        out_shape=[
            jax.ShapeDtypeStruct((N, HWp, Coutp), jnp.float32),
            jax.ShapeDtypeStruct((N, 2, Coutp), jnp.float32),
        ],
        compiler_params=pltpu.CompilerParams(
            dimension_semantics=("parallel",),
            vmem_limit_bytes=vmem_limit),
    )(xflat, w, mask)
    # TODO(synk): for very large single-image activation maps, additionally tile pass 1
    # over output-row blocks with a 2-row halo (manual DMA / element-offset index_map).

    # ---- fold global batch stats into a single per-channel scale/shift FMA ----
    count = jnp.float32(N * H * W)
    ssum = jnp.sum(stats, axis=0)                         # (2, Coutp)
    mean = ssum[0] / count
    var = ssum[1] / count - mean * mean                   # biased variance (BN training)
    gamma_p = jnp.pad(bn_gamma.astype(jnp.float32), (0, Coutp - Cout))
    beta_p = jnp.pad(bn_beta.astype(jnp.float32), (0, Coutp - Cout))
    scale = gamma_p * jax.lax.rsqrt(var + eps)
    shift = beta_p - mean * scale

    if pool:
        Ho, Wo, Wpair = H // 2, W // 2, Wp // 2
        y4 = y.reshape(N, H, Wpair, 2 * Coutp)            # free reshape: col pairs -> lanes
        scale2 = jnp.concatenate([scale, scale]).reshape(1, 2 * Coutp)
        shift2 = jnp.concatenate([shift, shift]).reshape(1, 2 * Coutp)
        out = pl.pallas_call(
            _make_bn_relu_pool_kernel(Coutp, Wo),
            grid=(N, Ho),
            in_specs=[
                pl.BlockSpec((1, 2, Wpair, 2 * Coutp), lambda n, p: (n, p, 0, 0)),
                pl.BlockSpec((1, 2 * Coutp), lambda n, p: (0, 0)),
                pl.BlockSpec((1, 2 * Coutp), lambda n, p: (0, 0)),
            ],
            out_specs=pl.BlockSpec((1, 1, Wo, Coutp), lambda n, p: (n, p, 0, 0)),
            out_shape=jax.ShapeDtypeStruct((N, Ho, Wo, Coutp), jnp.float32),
            compiler_params=pltpu.CompilerParams(
                dimension_semantics=("parallel", "parallel"),
                vmem_limit_bytes=vmem_limit),
        )(y4, scale2, shift2)
    else:
        TH = next(t for t in (8, 4, 2, 1) if H % t == 0)
        y3 = y.reshape(N, H, Wp, Coutp)
        scale1 = scale.reshape(1, Coutp)
        shift1 = shift.reshape(1, Coutp)
        out = pl.pallas_call(
            _make_bn_relu_kernel(TH, W, Coutp),
            grid=(N, H // TH),
            in_specs=[
                pl.BlockSpec((1, TH, Wp, Coutp), lambda n, p: (n, p, 0, 0)),
                pl.BlockSpec((1, Coutp), lambda n, p: (0, 0)),
                pl.BlockSpec((1, Coutp), lambda n, p: (0, 0)),
            ],
            out_specs=pl.BlockSpec((1, TH, W, Coutp), lambda n, p: (n, p, 0, 0)),
            out_shape=jax.ShapeDtypeStruct((N, H, W, Coutp), jnp.float32),
            compiler_params=pltpu.CompilerParams(
                dimension_semantics=("parallel", "parallel"),
                vmem_limit_bytes=vmem_limit),
        )(y3, scale1, shift1)

    # drop channel padding, back to NCHW
    return jnp.transpose(out[..., :Cout], (0, 3, 1, 2))


def _reference(x_nchw, conv_w_hwio, conv_b, bn_gamma, bn_beta, *, pool=False):
    """Pure-JAX reference with identical semantics (same bf16 input rounding as the kernel)."""
    x = jnp.transpose(x_nchw, (0, 2, 3, 1))
    x = x.astype(jnp.bfloat16).astype(jnp.float32)
    w = conv_w_hwio.astype(jnp.bfloat16).astype(jnp.float32)
    y = jax.lax.conv_general_dilated(
        x, w, window_strides=(1, 1), padding="SAME",
        dimension_numbers=("NHWC", "HWIO", "NHWC")) + conv_b.reshape(1, 1, 1, -1)
    mean = jnp.mean(y, axis=(0, 1, 2), keepdims=True)
    var = jnp.mean((y - mean) ** 2, axis=(0, 1, 2), keepdims=True)
    y = (y - mean) * jax.lax.rsqrt(var + 1e-5)
    y = y * bn_gamma.reshape(1, 1, 1, -1) + bn_beta.reshape(1, 1, 1, -1)
    y = jnp.maximum(y, 0.0)
    if pool:
        y = jnp.maximum(jnp.maximum(y[:, 0::2, 0::2, :], y[:, 0::2, 1::2, :]),
                        jnp.maximum(y[:, 1::2, 0::2, :], y[:, 1::2, 1::2, :]))
    return jnp.transpose(y, (0, 3, 1, 2))


if __name__ == "__main__":
    # ConvBlock(in_channels=4, out_channels=8, kernel_size=3, padding=1, pool=True/False)
    N, Cin, H, W, Cout = 2, 4, 16, 16, 8
    key = jax.random.PRNGKey(0)
    kx, kw, kb, kg, kbe = jax.random.split(key, 5)

    x = jax.random.normal(kx, (N, Cin, H, W), dtype=jnp.float32)
    conv_w = 0.1 * jax.random.normal(kw, (3, 3, Cin, Cout), dtype=jnp.float32)  # HWIO
    conv_b = 0.1 * jax.random.normal(kb, (Cout,), dtype=jnp.float32)
    bn_gamma = 1.0 + 0.1 * jax.random.normal(kg, (Cout,), dtype=jnp.float32)
    bn_beta = 0.1 * jax.random.normal(kbe, (Cout,), dtype=jnp.float32)

    # pool=True path
    out_pool = jax.block_until_ready(
        conv_block(x, conv_w, conv_b, bn_gamma, bn_beta, pool=True))
    assert out_pool.shape == (N, Cout, H // 2, W // 2), out_pool.shape
    ref_pool = jax.block_until_ready(
        _reference(x, conv_w, conv_b, bn_gamma, bn_beta, pool=True))
    np.testing.assert_allclose(np.asarray(out_pool), np.asarray(ref_pool),
                               rtol=2e-4, atol=2e-4)

    # pool=False path
    out_nopool = jax.block_until_ready(
        conv_block(x, conv_w, conv_b, bn_gamma, bn_beta, pool=False))
    assert out_nopool.shape == (N, Cout, H, W), out_nopool.shape
    ref_nopool = jax.block_until_ready(
        _reference(x, conv_w, conv_b, bn_gamma, bn_beta, pool=False))
    np.testing.assert_allclose(np.asarray(out_nopool), np.asarray(ref_nopool),
                               rtol=2e-4, atol=2e-4)

    print("KERNEL_OK")
</pallas_src>

<mosaic_0001>
module attributes {stable_mosaic.version = 11 : i64} {
  func.func @kernel(%arg0: i32, %arg1: memref<1x328x4xbf16, #tpu.memory_space<vmem>>, %arg2: memref<9x4x128xbf16, #tpu.memory_space<vmem>>, %arg3: memref<288x1xf32, #tpu.memory_space<vmem>>, %arg4: memref<1x288x128xf32, #tpu.memory_space<vmem>>, %arg5: memref<1x2x128xf32, #tpu.memory_space<vmem>>) attributes {dimension_semantics = [#tpu.dimension_semantics<parallel>], iteration_bounds = array<i64: 2>, scalar_prefetch = 0 : i64, scratch_operands = 0 : i64, tpu.core_type = #tpu.core_type<tc>, window_params = [{transform_indices = @transform_0, window_bounds = array<i64: 1, 328, 4>}, {pipeline_mode = #tpu.pipeline_mode<synchronous>, transform_indices = @transform_1, window_bounds = array<i64: 9, 4, 128>}, {pipeline_mode = #tpu.pipeline_mode<synchronous>, transform_indices = @transform_2, window_bounds = array<i64: 288, 1>}, {transform_indices = @transform_3, window_bounds = array<i64: 1, 288, 128>}, {transform_indices = @transform_4, window_bounds = array<i64: 1, 2, 128>}]} {
    %cst = arith.constant 0.000000e+00 : f32
    %0 = vector.broadcast %cst : f32 to vector<288x128xf32>
    %c0 = arith.constant 0 : index
    %c0_0 = arith.constant 0 : index
    %c0_1 = arith.constant 0 : index
    %1 = vector.load %arg1[%c0, %c0_0, %c0_1] : memref<1x328x4xbf16, #tpu.memory_space<vmem>>, vector<1x288x4xbf16>
    %2 = vector.shape_cast %1 : vector<1x288x4xbf16> to vector<288x4xbf16>
    %c0_2 = arith.constant 0 : index
    %c0_3 = arith.constant 0 : index
    %c0_4 = arith.constant 0 : index
    %3 = vector.load %arg2[%c0_2, %c0_3, %c0_4] : memref<9x4x128xbf16, #tpu.memory_space<vmem>>, vector<1x4x128xbf16>
    %4 = vector.shape_cast %3 : vector<1x4x128xbf16> to vector<4x128xbf16>
    %cst_5 = arith.constant dense<0.000000e+00> : vector<288x128xf32>
    %5 = tpu.matmul %2, %4, %cst_5 {dimension_numbers = #tpu.dot_dimension_numbers<[1], [0], [0], [1], [0, 0, 1, 1], [], []>} : vector<288x4xbf16>, vector<4x128xbf16>, vector<288x128xf32> -> vector<288x128xf32>
    %6 = arith.addf %0, %5 : vector<288x128xf32>
    %c0_6 = arith.constant 0 : index
    %c1 = arith.constant 1 : index
    %c0_7 = arith.constant 0 : index
    %7 = vector.load %arg1[%c0_6, %c1, %c0_7] : memref<1x328x4xbf16, #tpu.memory_space<vmem>>, vector<1x288x4xbf16>
    %8 = vector.shape_cast %7 : vector<1x288x4xbf16> to vector<288x4xbf16>
    %c1_8 = arith.constant 1 : index
    %c0_9 = arith.constant 0 : index
    %c0_10 = arith.constant 0 : index
    %9 = vector.load %arg2[%c1_8, %c0_9, %c0_10] : memref<9x4x128xbf16, #tpu.memory_space<vmem>>, vector<1x4x128xbf16>
    %10 = vector.shape_cast %9 : vector<1x4x128xbf16> to vector<4x128xbf16>
    %cst_11 = arith.constant dense<0.000000e+00> : vector<288x128xf32>
    %11 = tpu.matmul %8, %10, %cst_11 {dimension_numbers = #tpu.dot_dimension_numbers<[1], [0], [0], [1], [0, 0, 1, 1], [], []>} : vector<288x4xbf16>, vector<4x128xbf16>, vector<288x128xf32> -> vector<288x128xf32>
    %12 = arith.addf %6, %11 : vector<288x128xf32>
    %c0_12 = arith.constant 0 : index
    %c2 = arith.constant 2 : index
    %c0_13 = arith.constant 0 : index
    %13 = vector.load %arg1[%c0_12, %c2, %c0_13] : memref<1x328x4xbf16, #tpu.memory_space<vmem>>, vector<1x288x4xbf16>
    %14 = vector.shape_cast %13 : vector<1x288x4xbf16> to vector<288x4xbf16>
    %c2_14 = arith.constant 2 : index
    %c0_15 = arith.constant 0 : index
    %c0_16 = arith.constant 0 : index
    %15 = vector.load %arg2[%c2_14, %c0_15, %c0_16] : memref<9x4x128xbf16, #tpu.memory_space<vmem>>, vector<1x4x128xbf16>
    %16 = vector.shape_cast %15 : vector<1x4x128xbf16> to vector<4x128xbf16>
    %cst_17 = arith.constant dense<0.000000e+00> : vector<288x128xf32>
    %17 = tpu.matmul %14, %16, %cst_17 {dimension_numbers = #tpu.dot_dimension_numbers<[1], [0], [0], [1], [0, 0, 1, 1], [], []>} : vector<288x4xbf16>, vector<4x128xbf16>, vector<288x128xf32> -> vector<288x128xf32>
    %18 = arith.addf %12, %17 : vector<288x128xf32>
    %c0_18 = arith.constant 0 : index
    %c18 = arith.constant 18 : index
    %c0_19 = arith.constant 0 : index
    %19 = vector.load %arg1[%c0_18, %c18, %c0_19] : memref<1x328x4xbf16, #tpu.memory_space<vmem>>, vector<1x288x4xbf16>
    %20 = vector.shape_cast %19 : vector<1x288x4xbf16> to vector<288x4xbf16>
    %c3 = arith.constant 3 : index
    %c0_20 = arith.constant 0 : index
    %c0_21 = arith.constant 0 : index
    %21 = vector.load %arg2[%c3, %c0_20, %c0_21] : memref<9x4x128xbf16, #tpu.memory_space<vmem>>, vector<1x4x128xbf16>
    %22 = vector.shape_cast %21 : vector<1x4x128xbf16> to vector<4x128xbf16>
    %cst_22 = arith.constant dense<0.000000e+00> : vector<288x128xf32>
    %23 = tpu.matmul %20, %22, %cst_22 {dimension_numbers = #tpu.dot_dimension_numbers<[1], [0], [0], [1], [0, 0, 1, 1], [], []>} : vector<288x4xbf16>, vector<4x128xbf16>, vector<288x128xf32> -> vector<288x128xf32>
    %24 = arith.addf %18, %23 : vector<288x128xf32>
    %c0_23 = arith.constant 0 : index
    %c19 = arith.constant 19 : index
    %c0_24 = arith.constant 0 : index
    %25 = vector.load %arg1[%c0_23, %c19, %c0_24] : memref<1x328x4xbf16, #tpu.memory_space<vmem>>, vector<1x288x4xbf16>
    %26 = vector.shape_cast %25 : vector<1x288x4xbf16> to vector<288x4xbf16>
    %c4 = arith.constant 4 : index
    %c0_25 = arith.constant 0 : index
    %c0_26 = arith.constant 0 : index
    %27 = vector.load %arg2[%c4, %c0_25, %c0_26] : memref<9x4x128xbf16, #tpu.memory_space<vmem>>, vector<1x4x128xbf16>
    %28 = vector.shape_cast %27 : vector<1x4x128xbf16> to vector<4x128xbf16>
    %cst_27 = arith.constant dense<0.000000e+00> : vector<288x128xf32>
    %29 = tpu.matmul %26, %28, %cst_27 {dimension_numbers = #tpu.dot_dimension_numbers<[1], [0], [0], [1], [0, 0, 1, 1], [], []>} : vector<288x4xbf16>, vector<4x128xbf16>, vector<288x128xf32> -> vector<288x128xf32>
    %30 = arith.addf %24, %29 : vector<288x128xf32>
    %c0_28 = arith.constant 0 : index
    %c20 = arith.constant 20 : index
    %c0_29 = arith.constant 0 : index
    %31 = vector.load %arg1[%c0_28, %c20, %c0_29] : memref<1x328x4xbf16, #tpu.memory_space<vmem>>, vector<1x288x4xbf16>
    %32 = vector.shape_cast %31 : vector<1x288x4xbf16> to vector<288x4xbf16>
    %c5 = arith.constant 5 : index
    %c0_30 = arith.constant 0 : index
    %c0_31 = arith.constant 0 : index
    %33 = vector.load %arg2[%c5, %c0_30, %c0_31] : memref<9x4x128xbf16, #tpu.memory_space<vmem>>, vector<1x4x128xbf16>
    %34 = vector.shape_cast %33 : vector<1x4x128xbf16> to vector<4x128xbf16>
    %cst_32 = arith.constant dense<0.000000e+00> : vector<288x128xf32>
    %35 = tpu.matmul %32, %34, %cst_32 {dimension_numbers = #tpu.dot_dimension_numbers<[1], [0], [0], [1], [0, 0, 1, 1], [], []>} : vector<288x4xbf16>, vector<4x128xbf16>, vector<288x128xf32> -> vector<288x128xf32>
    %36 = arith.addf %30, %35 : vector<288x128xf32>
    %c0_33 = arith.constant 0 : index
    %c36 = arith.constant 36 : index
    %c0_34 = arith.constant 0 : index
    %37 = vector.load %arg1[%c0_33, %c36, %c0_34] : memref<1x328x4xbf16, #tpu.memory_space<vmem>>, vector<1x288x4xbf16>
    %38 = vector.shape_cast %37 : vector<1x288x4xbf16> to vector<288x4xbf16>
    %c6 = arith.constant 6 : index
    %c0_35 = arith.constant 0 : index
    %c0_36 = arith.constant 0 : index
    %39 = vector.load %arg2[%c6, %c0_35, %c0_36] : memref<9x4x128xbf16, #tpu.memory_space<vmem>>, vector<1x4x128xbf16>
    %40 = vector.shape_cast %39 : vector<1x4x128xbf16> to vector<4x128xbf16>
    %cst_37 = arith.constant dense<0.000000e+00> : vector<288x128xf32>
    %41 = tpu.matmul %38, %40, %cst_37 {dimension_numbers = #tpu.dot_dimension_numbers<[1], [0], [0], [1], [0, 0, 1, 1], [], []>} : vector<288x4xbf16>, vector<4x128xbf16>, vector<288x128xf32> -> vector<288x128xf32>
    %42 = arith.addf %36, %41 : vector<288x128xf32>
    %c0_38 = arith.constant 0 : index
    %c37 = arith.constant 37 : index
    %c0_39 = arith.constant 0 : index
    %43 = vector.load %arg1[%c0_38, %c37, %c0_39] : memref<1x328x4xbf16, #tpu.memory_space<vmem>>, vector<1x288x4xbf16>
    %44 = vector.shape_cast %43 : vector<1x288x4xbf16> to vector<288x4xbf16>
    %c7 = arith.constant 7 : index
    %c0_40 = arith.constant 0 : index
    %c0_41 = arith.constant 0 : index
    %45 = vector.load %arg2[%c7, %c0_40, %c0_41] : memref<9x4x128xbf16, #tpu.memory_space<vmem>>, vector<1x4x128xbf16>
    %46 = vector.shape_cast %45 : vector<1x4x128xbf16> to vector<4x128xbf16>
    %cst_42 = arith.constant dense<0.000000e+00> : vector<288x128xf32>
    %47 = tpu.matmul %44, %46, %cst_42 {dimension_numbers = #tpu.dot_dimension_numbers<[1], [0], [0], [1], [0, 0, 1, 1], [], []>} : vector<288x4xbf16>, vector<4x128xbf16>, vector<288x128xf32> -> vector<288x128xf32>
    %48 = arith.addf %42, %47 : vector<288x128xf32>
    %c0_43 = arith.constant 0 : index
    %c38 = arith.constant 38 : index
    %c0_44 = arith.constant 0 : index
    %49 = vector.load %arg1[%c0_43, %c38, %c0_44] : memref<1x328x4xbf16, #tpu.memory_space<vmem>>, vector<1x288x4xbf16>
    %50 = vector.shape_cast %49 : vector<1x288x4xbf16> to vector<288x4xbf16>
    %c8 = arith.constant 8 : index
    %c0_45 = arith.constant 0 : index
    %c0_46 = arith.constant 0 : index
    %51 = vector.load %arg2[%c8, %c0_45, %c0_46] : memref<9x4x128xbf16, #tpu.memory_space<vmem>>, vector<1x4x128xbf16>
    %52 = vector.shape_cast %51 : vector<1x4x128xbf16> to vector<4x128xbf16>
    %cst_47 = arith.constant dense<0.000000e+00> : vector<288x128xf32>
    %53 = tpu.matmul %50, %52, %cst_47 {dimension_numbers = #tpu.dot_dimension_numbers<[1], [0], [0], [1], [0, 0, 1, 1], [], []>} : vector<288x4xbf16>, vector<4x128xbf16>, vector<288x128xf32> -> vector<288x128xf32>
    %54 = arith.addf %48, %53 : vector<288x128xf32>
    %c0_48 = arith.constant 0 : index
    %c0_49 = arith.constant 0 : index
    %c0_50 = arith.constant 0 : index
    %55 = vector.load %arg4[%c0_48, %c0_49, %c0_50] : memref<1x288x128xf32, #tpu.memory_space<vmem>>, vector<1x288x128xf32>
    %56 = vector.shape_cast %55 : vector<1x288x128xf32> to vector<288x128xf32>
    %57 = vector.shape_cast %54 : vector<288x128xf32> to vector<1x288x128xf32>
    tpu.vector_store %arg4[%c0_48, %c0_49, %c0_50], %57 {strides = array<i32>} : memref<1x288x128xf32, #tpu.memory_space<vmem>>, vector<1x288x128xf32>,
    %c0_51 = arith.constant 0 : index
    %c0_52 = arith.constant 0 : index
    %58 = vector.load %arg3[%c0_51, %c0_52] : memref<288x1xf32, #tpu.memory_space<vmem>>, vector<288x1xf32>
    %59 = vector.broadcast %58 : vector<288x1xf32> to vector<288x128xf32>
    %60 = arith.mulf %54, %59 : vector<288x128xf32>
    %cst_53 = arith.constant dense<0.000000e+00> : vector<128xf32>
    %61 = vector.multi_reduction <add>, %60, %cst_53 [0] : vector<288x128xf32> to vector<128xf32>
    %62 = vector.shape_cast %61 : vector<128xf32> to vector<1x128xf32>
    %c0_54 = arith.constant 0 : index
    %c0_55 = arith.constant 0 : index
    %c0_56 = arith.constant 0 : index
    %63 = vector.load %arg5[%c0_54, %c0_55, %c0_56] : memref<1x2x128xf32, #tpu.memory_space<vmem>>, vector<1x1x128xf32>
    %64 = vector.shape_cast %63 : vector<1x1x128xf32> to vector<1x128xf32>
    %65 = vector.shape_cast %62 : vector<1x128xf32> to vector<1x1x128xf32>
    tpu.vector_store %arg5[%c0_54, %c0_55, %c0_56], %65 {strides = array<i32>} : memref<1x2x128xf32, #tpu.memory_space<vmem>>, vector<1x1x128xf32>,
    %66 = arith.mulf %60, %60 : vector<288x128xf32>
    %cst_57 = arith.constant dense<0.000000e+00> : vector<128xf32>
    %67 = vector.multi_reduction <add>, %66, %cst_57 [0] : vector<288x128xf32> to vector<128xf32>
    %68 = vector.shape_cast %67 : vector<128xf32> to vector<1x128xf32>
    %c0_58 = arith.constant 0 : index
    %c1_59 = arith.constant 1 : index
    %c0_60 = arith.constant 0 : index
    %69 = vector.load %arg5[%c0_58, %c1_59, %c0_60] : memref<1x2x128xf32, #tpu.memory_space<vmem>>, vector<1x1x128xf32>
    %70 = vector.shape_cast %69 : vector<1x1x128xf32> to vector<1x128xf32>
    %71 = vector.shape_cast %68 : vector<1x128xf32> to vector<1x1x128xf32>
    tpu.vector_store %arg5[%c0_58, %c1_59, %c0_60], %71 {strides = array<i32>} : memref<1x2x128xf32, #tpu.memory_space<vmem>>, vector<1x1x128xf32>,
    return
  }
  func.func @transform_0(%arg0: i32) -> (i32, i32, i32) {
    %c0_i32 = arith.constant 0 : i32
    %c0_i32_0 = arith.constant 0 : i32
    %c0_i32_1 = arith.constant 0 : i32
    return %arg0, %c0_i32, %c0_i32_0 : i32, i32, i32
  }
  func.func @transform_1(%arg0: i32) -> (i32, i32, i32) {
    %c0_i32 = arith.constant 0 : i32
    %c0_i32_0 = arith.constant 0 : i32
    %c0_i32_1 = arith.constant 0 : i32
    %c0_i32_2 = arith.constant 0 : i32
    return %c0_i32, %c0_i32_0, %c0_i32_1 : i32, i32, i32
  }
  func.func @transform_2(%arg0: i32) -> (i32, i32) {
    %c0_i32 = arith.constant 0 : i32
    %c0_i32_0 = arith.constant 0 : i32
    %c0_i32_1 = arith.constant 0 : i32
    return %c0_i32, %c0_i32_0 : i32, i32
  }
  func.func @transform_3(%arg0: i32) -> (i32, i32, i32) {
    %c0_i32 = arith.constant 0 : i32
    %c0_i32_0 = arith.constant 0 : i32
    %c0_i32_1 = arith.constant 0 : i32
    return %arg0, %c0_i32, %c0_i32_0 : i32, i32, i32
  }
  func.func @transform_4(%arg0: i32) -> (i32, i32, i32) {
    %c0_i32 = arith.constant 0 : i32
    %c0_i32_0 = arith.constant 0 : i32
    %c0_i32_1 = arith.constant 0 : i32
    return %arg0, %c0_i32, %c0_i32_0 : i32, i32, i32
  }
}

module attributes {stable_mosaic.version = 11 : i64} {
  func.func @kernel(%arg0: i32, %arg1: i32, %arg2: memref<1x2x9x256xf32, #tpu.memory_space<vmem>>, %arg3: memref<1x256xf32, #tpu.memory_space<vmem>>, %arg4: memref<1x256xf32, #tpu.memory_space<vmem>>, %arg5: memref<1x1x8x128xf32, #tpu.memory_space<vmem>>) attributes {dimension_semantics = [#tpu.dimension_semantics<parallel>, #tpu.dimension_semantics<parallel>], iteration_bounds = array<i64: 2, 8>, scalar_prefetch = 0 : i64, scratch_operands = 0 : i64, tpu.core_type = #tpu.core_type<tc>, window_params = [{transform_indices = @transform_0, window_bounds = array<i64: 1, 2, 9, 256>}, {pipeline_mode = #tpu.pipeline_mode<synchronous>, transform_indices = @transform_1, window_bounds = array<i64: 1, 256>}, {pipeline_mode = #tpu.pipeline_mode<synchronous>, transform_indices = @transform_2, window_bounds = array<i64: 1, 256>}, {transform_indices = @transform_3, window_bounds = array<i64: 1, 1, 8, 128>}]} {
    %c0 = arith.constant 0 : index
    %c0_0 = arith.constant 0 : index
    %0 = vector.load %arg3[%c0, %c0_0] : memref<1x256xf32, #tpu.memory_space<vmem>>, vector<1x256xf32>
    %c0_1 = arith.constant 0 : index
    %c0_2 = arith.constant 0 : index
    %1 = vector.load %arg4[%c0_1, %c0_2] : memref<1x256xf32, #tpu.memory_space<vmem>>, vector<1x256xf32>
    %c0_3 = arith.constant 0 : index
    %c0_4 = arith.constant 0 : index
    %c0_5 = arith.constant 0 : index
    %c0_6 = arith.constant 0 : index
    %2 = vector.load %arg2[%c0_3, %c0_4, %c0_5, %c0_6] : memref<1x2x9x256xf32, #tpu.memory_space<vmem>>, vector<1x1x9x256xf32>
    %3 = vector.shape_cast %2 : vector<1x1x9x256xf32> to vector<9x256xf32>
    %4 = vector.broadcast %0 : vector<1x256xf32> to vector<9x256xf32>
    %5 = arith.mulf %3, %4 : vector<9x256xf32>
    %6 = vector.broadcast %1 : vector<1x256xf32> to vector<9x256xf32>
    %7 = arith.addf %5, %6 : vector<9x256xf32>
    %cst = arith.constant 0.000000e+00 : f32
    %8 = vector.broadcast %cst : f32 to vector<9x256xf32>
    %9 = arith.maximumf %7, %8 : vector<9x256xf32>
    %c0_7 = arith.constant 0 : index
    %c1 = arith.constant 1 : index
    %c0_8 = arith.constant 0 : index
    %c0_9 = arith.constant 0 : index
    %10 = vector.load %arg2[%c0_7, %c1, %c0_8, %c0_9] : memref<1x2x9x256xf32, #tpu.memory_space<vmem>>, vector<1x1x9x256xf32>
    %11 = vector.shape_cast %10 : vector<1x1x9x256xf32> to vector<9x256xf32>
    %12 = vector.broadcast %0 : vector<1x256xf32> to vector<9x256xf32>
    %13 = arith.mulf %11, %12 : vector<9x256xf32>
    %14 = vector.broadcast %1 : vector<1x256xf32> to vector<9x256xf32>
    %15 = arith.addf %13, %14 : vector<9x256xf32>
    %cst_10 = arith.constant 0.000000e+00 : f32
    %16 = vector.broadcast %cst_10 : f32 to vector<9x256xf32>
    %17 = arith.maximumf %15, %16 : vector<9x256xf32>
    %18 = arith.maximumf %9, %17 : vector<9x256xf32>
    %19 = vector.extract_strided_slice %18 {offsets = [0, 0], sizes = [9, 128], strides = [1, 1]} : vector<9x256xf32> to vector<9x128xf32>
    %20 = vector.extract_strided_slice %18 {offsets = [0, 128], sizes = [9, 128], strides = [1, 1]} : vector<9x256xf32> to vector<9x128xf32>
    %21 = arith.maximumf %19, %20 : vector<9x128xf32>
    %22 = vector.extract_strided_slice %21 {offsets = [0, 0], sizes = [8, 128], strides = [1, 1]} : vector<9x128xf32> to vector<8x128xf32>
    %c0_11 = arith.constant 0 : index
    %c0_12 = arith.constant 0 : index
    %c0_13 = arith.constant 0 : index
    %c0_14 = arith.constant 0 : index
    %23 = vector.load %arg5[%c0_11, %c0_12, %c0_13, %c0_14] : memref<1x1x8x128xf32, #tpu.memory_space<vmem>>, vector<1x1x8x128xf32>
    %24 = vector.shape_cast %23 : vector<1x1x8x128xf32> to vector<8x128xf32>
    %25 = vector.shape_cast %22 : vector<8x128xf32> to vector<1x1x8x128xf32>
    tpu.vector_store %arg5[%c0_11, %c0_12, %c0_13, %c0_14], %25 {strides = array<i32>} : memref<1x1x8x128xf32, #tpu.memory_space<vmem>>, vector<1x1x8x128xf32>,
    return
  }
  func.func @transform_0(%arg0: i32, %arg1: i32) -> (i32, i32, i32, i32) {
    %c0_i32 = arith.constant 0 : i32
    %c0_i32_0 = arith.constant 0 : i32
    %c0_i32_1 = arith.constant 0 : i32
    return %arg0, %arg1, %c0_i32, %c0_i32_0 : i32, i32, i32, i32
  }
  func.func @transform_1(%arg0: i32, %arg1: i32) -> (i32, i32) {
    %c0_i32 = arith.constant 0 : i32
    %c0_i32_0 = arith.constant 0 : i32
    %c0_i32_1 = arith.constant 0 : i32
    return %c0_i32, %c0_i32_0 : i32, i32
  }
  func.func @transform_2(%arg0: i32, %arg1: i32) -> (i32, i32) {
    %c0_i32 = arith.constant 0 : i32
    %c0_i32_0 = arith.constant 0 : i32
    %c0_i32_1 = arith.constant 0 : i32
    return %c0_i32, %c0_i32_0 : i32, i32
  }
  func.func @transform_3(%arg0: i32, %arg1: i32) -> (i32, i32, i32, i32) {
    %c0_i32 = arith.constant 0 : i32
    %c0_i32_0 = arith.constant 0 : i32
    %c0_i32_1 = arith.constant 0 : i32
    return %arg0, %arg1, %c0_i32, %c0_i32_0 : i32, i32, i32, i32
  }
}

</mosaic_0001>

<bundles_post_ra>
// kernel: conv_block.3
= control target key start
LH: loop header
LB: loop body
LE: loop exit
PB: predicated region body
PF: predicated region fallthrough
CT: control target
= control target key end

     0   :  { %s459_s12 = smov 0   ;;  %s461_s13 = smov 0   ;;  %s521_s0 = inlined_call_operand.vmem [shape: f32[2,16,9,256], index: 0, kind: input, shape index: {}]   ;;  %s522_s1 = inlined_call_operand.vmem [shape: f32[1,256], index: 1, kind: input, shape index: {}]   ;;  %s523_s2 = inlined_call_operand.vmem [shape: f32[1,256], index: 2, kind: input, shape index: {}]   ;;  %s524_s3 = inlined_call_operand.vmem [shape: f32[2,8,8,128], index: 3, kind: output, shape index: {}]  }
   0x1   :  { %s463_s14 = smov 0   ;;  %s465_s15 = smov 0  }
   0x2   :  { %s467_s16 = smov 0  }
   0x3 LB: > { %s22_s17 = sadd.s32 1, %s429_s14  ;;  %s25_s18 = sadd.s32 1, %s433_s15  ;;  %s437_s16 = sphi %s467_s16, %s13_s16   ;;  %s433_s15 = sphi %s465_s15, %s528_s15   ;;  %s429_s14 = sphi %s463_s14, %s527_s14   ;;  %s425_s13 = sphi %s461_s13, %s526_s13   ;;  %s421_s12 = sphi %s459_s12, %s525_s12  }
   0x4   : > { %p23_p0 = scmp.ge.s32.totalorder %s22_s17, 8  ;;  %p348_p1 = scmp.ge.s32.totalorder %s437_s16, 1 }
   0x5   : > { %p159_p2 = scmp.lt.s32.totalorder %s437_s16, 17 }
   0x6   : > { %s530_s17 = smov (%p23_p0, %s22_s17), 0  ;;  %s532_s18 = smov (!%p23_p0, %s25_s18), %s433_s15 }
   0x7   : > { %p160_p3 = pnand %p348_p1, %p159_p2  ;;  %p27_p4 = scmp.ge.s32.totalorder %s532_s18, 2 }
   0x8   : > { %s349_s19 = sshll.u32 (!%p160_p3), %s421_s12, 1  ;;  %p192_p5 = scmp.lt.s32.totalorder (!%p160_p3), %s425_s13, 1  ;;  %v215_v0 = vlaneseq (!%p160_p3)  ;;  %v210_v2 = vld [vmem:[%s522_s1] sm:$0x3] (!%p160_p3) }
   0x9   : > { %s534_s18 = smov (%p27_p4, %s532_s18), 0  ;;  %163 = sbr.rel (%p160_p3) target bundleno = 34 (0x22), region = 32 }
   0xa   : > { %p194_p6 = scmp.lt.s32.totalorder (!%p160_p3), %s349_s19, 15  ;;  %v216_v1 = vshrl.u32 (!%p160_p3), %v215_v0, 7  ;;  %p204_p7 = scmp.lt.s32.totalorder (!%p160_p3), %s421_s12, 7  ;;  %v211_v5 = vld [vmem:[%s523_s2] sm:$0x3] (!%p160_p3) }
   0xc   : > { %v217_v3 = vsub.s32 (!%p160_p3), 0, %v216_v1  ;;  %v221_v4 = vsub.s32 (!%p160_p3), 1, %v216_v1 }
   0xe   : > { %v218_v6 = vrot.slane (!%p160_p3), %v210_v2, %v217_v3  ;;  %v222_v7 = vrot.slane (!%p160_p3), %v210_v2, %v221_v4  ;;  %v231_v8 = vrot.slane (!%p160_p3), %v211_v5, %v217_v3  ;;  %v235_v9 = vrot.slane (!%p160_p3), %v211_v5, %v221_v4 }
  0x10   : > { %s536_s13 = smov (!%p192_p5, %s425_s13), 1  ;;  %s538_s19 = smov (!%p194_p6, %s349_s19), 15 }
  0x11   : > { %s351_s22 = sshll.u32 %s536_s13, 6  ;;  %s350_s23 = sshll.u32 %s538_s19, 2 }
  0x12   : > { %s198_s26 = sadd.s32 %s351_s22, %s350_s23  ;;  %s353_s4 = sshll.u32 %s536_s13, 3 }
  0x13   : > { %s352_s27 = sshll.u32 %s198_s26, 3  ;;  %s540_s12 = smov (!%p204_p7, %s421_s12), 7 }
  0x14   : > { %s200_s30 = scalar_lea.vmem %s521_s0, %s352_s27  ;;  %s207_s5 = sadd.s32 %s353_s4, %s540_s12 }
  0x15   : > { %v212_v10 = vld [vmem:[%s200_s30] sm:$0xff]  ;;  %v213_v11 = vld [vmem:[%s200_s30 + $0x8] sm:$0xff]  ;;  %s354_s6 = sshll.u32 %s207_s5, 3 }
  0x16   : > { %v355_v12 = vld [vmem:[%s200_s30 + $0x20] sm:$0xff]  ;;  %v225_v13 = vmul.f32 %v218_v6, %v212_v10  ;;  %v226_v14 = vmul.f32 %v222_v7, %v213_v11  ;;  %v356_v15 = vld [vmem:[%s200_s30 + $0x28] sm:$0xff]  ;;  %s209_s9 = scalar_lea.vmem %s524_s3, %s354_s6 }
  0x17   : > { %v245_v16 = vmul.f32 %v355_v12, %v218_v6  ;;  %v246_v17 = vmul.f32 %v356_v15, %v222_v7 }
  0x18   : > { %v238_v18 = vadd.f32 %v231_v8, %v225_v13  ;;  %v239_v19 = vadd.f32 %v235_v9, %v226_v14 }
  0x19   : > { %v247_v20 = vadd.f32 %v245_v16, %v231_v8  ;;  %v248_v21 = vadd.f32 %v246_v17, %v235_v9 }
  0x1a   : > { %v240_v22 = vmax.f32 %v238_v18, 0.0  ;;  %v241_v23 = vmax.f32 %v239_v19, 0.0 }
  0x1b   : > { %v249_v24 = vmax.f32 %v247_v20, 0.0  ;;  %v250_v25 = vmax.f32 %v248_v21, 0.0 }
  0x1d   : > { %v251_v26 = vmax.f32 %v240_v22, %v249_v24  ;;  %v252_v27 = vmax.f32 %v241_v23, %v250_v25 }
  0x1f   : > { %v253_v28 = vmax.f32 %v251_v26, %v252_v27 }
  0x21   : > { %254 = vst [vmem:[%s209_s9] sm:$0xff] %v253_v28 }
  0x22 PF: > { %s13_s16 = sadd.s32 1, %s437_s16   ;;  %s525_s12 = smov %s429_s14 }
  0x23   : > { %p10_p8 = scmp.ge.s32.totalorder %s13_s16, 18   ;;  %s526_s13 = smov %s433_s15 }
  0x24   : > { %s527_s14 = smov %s530_s17  ;;  %s528_s15 = smov %s534_s18 }
  0x25   :  { %12 = sbr.rel (!%p10_p8) target bundleno = 3 (0x3), region = 63 }

// kernel: conv_block.2
= control target key start
LH: loop header
LB: loop body
LE: loop exit
PB: predicated region body
PF: predicated region fallthrough
CT: control target
= control target key end

     0   :  { %s5327_s15 = smov 0   ;;  %s6382_s0 = inlined_call_operand.vmem [shape: bf16[2,328,4], index: 0, kind: input, shape index: {}]   ;;  %s6383_s1 = inlined_call_operand.vmem [shape: bf16[9,4,128], index: 1, kind: input, shape index: {}]   ;;  %s6384_s2 = inlined_call_operand.vmem [shape: f32[288,1], index: 2, kind: input, shape index: {}]   ;;  %s6385_s3 = inlined_call_operand.vmem [shape: f32[2,288,128], index: 3, kind: output, shape index: {0}]   ;;  %s6386_s4 = inlined_call_operand.vmem [shape: f32[2,2,128], index: 4, kind: output, shape index: {1}]  }
   0x1 LB: > { %s4152_s16 = sadd.s32 4294967295, %s5299_s15   ;;  %p4156_p0 = scmp.ge.s32.totalorder %s5299_s15, 1  ;;  %s5299_s15 = sphi %s5327_s15, %s15_s15  }
   0x2   : > { %p165_p1 = scmp.lt.s32.totalorder %s5299_s15, 3 }
   0x4   : > { %p166_p2 = pnand %p4156_p0, %p165_p1 }
   0x5   : > { %vm547_vm0 = vcmask (!%p166_p2), 1041408   ;;  %v4274_v0 = vld [vmem:[%s6383_s1 + $0x8] sm:$0x3] (!%p166_p2)  ;;  %v4160_v1 = vld [vmem:[%s6383_s1 + $0x2] sm:$0x3] (!%p166_p2)  ;;  %p195_p3 = scmp.lt.s32.totalorder (!%p166_p2), %s4152_s16, 1 }
   0x6   : > { %169 = sbr.rel (%p166_p2) target bundleno = 591 (0x24f), region = 32  ;;  %5201 = vmatprep.subr.msk.bf16.mxu0 (!%p166_p2), %vm547_vm0, %v4274_v0  ;;  %5197 = vmatprep.subr.msk.bf16.mxu1 (!%p166_p2), %vm547_vm0, %v4160_v1  ;;  %v5344_v2 = vsel (!%p166_p2), %vm547_vm0, %v4274_v0, 0  ;;  %v549_v3 = vsel (!%p166_p2), %vm547_vm0, %v4160_v1, 0  ;;  %v4294_v4 = vld [vmem:[%s6383_s1 + $0xa] sm:$0x3] (!%p166_p2)  ;;  %vm492_vm2 = vcmask (!%p166_p2), 31744  }
   0x7   : > { %4718 = vmatpush3.bf16.msra.mxu0 (!%p166_p2), %v5344_v2  ;;  %4566 = vmatpush3.bf16.msra.mxu1 (!%p166_p2), %v549_v3  ;;  %v246_v5 = vld [vmem:[%s6383_s1] sm:$0x3] (!%p166_p2)  ;;  %vm343_vm1 = vsmask.f32 (!%p166_p2), 7424  ;;  %v5365_v6 = vsel (!%p166_p2), %vm547_vm0, %v4294_v4, 0  ;;  %vm2150_vm4 = vcmask (!%p166_p2), 1045504  }
   0x8   : > { %5203 = vmatprep.subr.msk.bf16.mxu0 (!%p166_p2), %vm547_vm0, %v4294_v4  ;;  %5198 = vmatprep.subr.msk.bf16.mxu1 (!%p166_p2), %vm547_vm0, %v246_v5  ;;  %vm1703_vm3 = vsmask.f32 (!%p166_p2), 6400  ;;  %v765_v12 = vsel (!%p166_p2), %vm547_vm0, %v246_v5, 0  ;;  %v5413_v39 = vld [vmem:[%s6383_s1 + $0x4] sm:$0x3] (!%p166_p2)  ;;  %vm950_vm5 = vcmask (!%p166_p2), 1046528  }
   0x9   : > { %v5447_v1 = vld [vmem:[%s6383_s1 + $0xc] sm:$0x3] (!%p166_p2)  ;;  %vm2903_vm6 = vsmask.f32 (!%p166_p2), 5376  ;;  %vm3350_vm7 = vcmask (!%p166_p2), 1044480  }
   0xd   : > { %s6388_s16 = smov (!%p195_p3, %s4152_s16), 1 }
   0xe   : > { %s5207_s25 = smul.u32 164, %s6388_s16  ;;  %s4159_s23 = sshll.u32 %s6388_s16, 1 }
   0xf   : > { %s208_s26 = scalar_lea.vmem %s6386_s4, %s4159_s23 }
  0x10   : > { %s5362_s28 = scalar_lea.vmem %s6382_s0, %s5207_s25 }
  0x11   : > { %v210_v7 = vld [vmem:[%s5362_s28] sm:$0xf]  ;;  %v5369_v8 = vld [vmem:[%s5362_s28 + $0x4] sm:$0xf]  ;;  %v5375_v10 = vld [vmem:[%s5362_s28 + $0x8] sm:$0xff]  }
  0x12   : > { %v5372_v9 = vcombine.low %v210_v7, %v5369_v8  ;;  %v1258_v11 = vld [vmem:[%s5362_s28 + $0x8] sm:$0xe]  ;;  %v5380_v13 = vld [vmem:[%s5362_s28 + $0xc] sm:$0xf]  ;;  %v352_v16 = vshll.u32 %v5375_v10, 16  ;;  %v356_v17 = vshrl.u32 %v5375_v10, 16 }
  0x13   : > { %v5387_v18 = vld [vmem:[%s5362_s28 + $0x10] sm:$0xff]   ;;  %v5393_v20 = vcombine.low %v1258_v11, %v5380_v13  ;;  %v5401_v28 = vld [vmem:[%s5362_s28 + $0x18] sm:$0xff]   ;;  %v5407_v34 = vld [vmem:[%s5362_s28 + $0x20] sm:$0xff]  }
  0x14   : > { %v345_v14 = vshrl.u32 %v5372_v9, 16  ;;  %v347_v15 = vshll.u32 %v5372_v9, 16  ;;  %v5390_v19 = vld [vmem:[%s5362_s28 + $0x10] sm:$0xff]   ;;  %v354_v22 = vrot.slane %v352_v16, 1  ;;  %v1713_v23 = vshrl.u32 %v5387_v18, 16  ;;  %v5404_v33 = vld [vmem:[%s5362_s28 + $0x18] sm:$0xff]  }
  0x15   : > { %v1716_v24 = vshll.u32 %v5387_v18, 16  ;;  %v1705_v25 = vshrl.u32 %v5393_v20, 16  ;;  %v1708_v26 = vshll.u32 %v5393_v20, 16  ;;  %v360_v27 = vshll.u32 %v5390_v19, 16  ;;  %v5422_v48 = vld [vmem:[%s5362_s28 + $0x20] sm:$0xff]   ;;  %v5425_v49 = vld [vmem:[%s5362_s28 + $0x28] sm:$0xff]  }
  0x16   : > { %v349_v21 = vrot.slane %v347_v15, 1  ;;  %v358_v30 = vor.u32 %v356_v17, %v354_v22  ;;  %v1715_v31 = vrot.slane %v1713_v23, 1  ;;  %v1722_v38 = vshrl.u32 %v5401_v28, 16  ;;  %v5431_v54 = vld [vmem:[%s5362_s28 + $0x28] sm:$0xff]   ;;  %v5437_v59 = vld [vmem:[%s5362_s28 + $0x30] sm:$0xff]   ;;  %v5461_v23 = vld [vmem:[%s5362_s28 + $0x38] sm:$0xff]  }
  0x17   : > { %v1718_v32 = vrot.slane %v1716_v24, 2  ;;  %v1707_v35 = vrot.slane %v1705_v25, 1  ;;  %v1710_v36 = vrot.slane %v1708_v26, 2  ;;  %v362_v37 = vrot.slane %v360_v27, 1  ;;  %v5442_v0 = vld [vmem:[%s5362_s28 + $0x30] sm:$0xff]  }
  0x18   : > { %v350_v29 = vor.u32 %v349_v21, %v345_v14  ;;  %v1725_v42 = vshll.u32 %v5401_v28, 16  ;;  %v364_v43 = vshrl.u32 %v5390_v19, 16  ;;  %v1724_v46 = vrot.slane %v1722_v38, 1 }
  0x19   : > { %v1719_v41 = vor.u32 %v1718_v32, %v1715_v31  ;;  %v1711_v44 = vor.u32 %v1710_v36, %v1707_v35  ;;  %v363_v45 = vsel %vm343_vm1, %v358_v30, %v362_v37  ;;  %v368_v47 = vshll.u32 %v5404_v33, 16  ;;  %v5470_v35 = vld [vmem:[%s5362_s28 + $0x38] sm:$0xff]  }
  0x1a   : > { %v355_v40 = vsel %vm343_vm1, %v350_v29, %v354_v22  ;;  %v1727_v50 = vrot.slane %v1725_v42, 2  ;;  %v366_v51 = vor.u32 %v364_v43, %v362_v37  ;;  %v1731_v52 = vshrl.u32 %v5407_v34, 16 }
  0x1b   : > { %4567 = vmatprep.mubr.msk.bf16.mxu1 %vm492_vm2, %v355_v40  ;;  %v1734_v53 = vshll.u32 %v5407_v34, 16  ;;  %v1720_v55 = vsel %vm1703_vm3, %v1711_v44, %v1719_v41  ;;  %v370_v56 = vrot.slane %v368_v47, 1  ;;  %v372_v57 = vshrl.u32 %v5404_v33, 16  ;;  %v5481_v44 = vld [vmem:[%s5362_s28 + $0x40] sm:$0xff]  }
  0x1c   : > { %4568 = vmatmul.mubr.msk.bf16.vlgmr.msra.gmra.mrb[0].mxu1 %vm492_vm2, %v363_v45  ;;  %v376_v58 = vshll.u32 %v5422_v48, 16  ;;  %4719 = vmatprep.mubr.msk.bf16.mxu0 %vm492_vm2, %v1720_v55  ;;  %v1728_v60 = vor.u32 %v1727_v50, %v1724_v46  ;;  %v1733_v61 = vrot.slane %v1731_v52, 1  ;;  %v1740_v63 = vshrl.u32 %v5425_v49, 16 }
  0x1d   : > { %4604 = vmatpush3.bf16.msra.mxu1 %v765_v12  ;;  %v1736_v62 = vrot.slane %v1734_v53, 2  ;;  %v371_v3 = vsel %vm343_vm1, %v366_v51, %v370_v56  ;;  %v374_v4 = vor.u32 %v372_v57, %v370_v56  ;;  %v1743_v7 = vshll.u32 %v5425_v49, 16  ;;  %v5486_v51 = vld [vmem:[%s5362_s28 + $0x40] sm:$0xff]  }
  0x1e   : > { %5199 = vmatprep.subr.msk.bf16.mxu1 %vm547_vm0, %v5413_v39  ;;  %v378_v5 = vrot.slane %v376_v58, 1  ;;  %v1729_v11 = vsel %vm1703_vm3, %v1719_v41, %v1728_v60  ;;  %4571 = vmatprep.mubr.msk.bf16.mxu1 %vm492_vm2, %v371_v3  ;;  %v1742_v14 = vrot.slane %v1740_v63, 1  ;;  %v380_v15 = vshrl.u32 %v5422_v48, 16  ;;  %v5497_v63 = vld [vmem:[%s5362_s28 + $0x48] sm:$0xff]  }
  0x1f   : > { %v1737_v12 = vor.u32 %v1736_v62, %v1733_v61  ;;  %4720 = vmatmul.mubr.msk.bf16.vlgmr.msra.gmra.mrb[0].mxu0 %vm492_vm2, %v1729_v11  ;;  %v1745_v17 = vrot.slane %v1743_v7, 2  ;;  %v384_v21 = vshll.u32 %v5431_v54, 16  ;;  %v1749_v22 = vshrl.u32 %v5437_v59, 16  ;;  %v5494_v62 = vld [vmem:[%s5362_s28 + $0x48] sm:$0xff]  }
  0x20   : > { %v379_v16 = vsel %vm343_vm1, %v374_v4, %v378_v5  ;;  %4756 = vmatpush3.bf16.msra.mxu0 %v5365_v6  ;;  %v382_v25 = vor.u32 %v380_v15, %v378_v5  ;;  %v1752_v26 = vshll.u32 %v5437_v59, 16  ;;  %v388_v27 = vshrl.u32 %v5431_v54, 16 }
  0x21   : > { %v1738_v24 = vsel %vm1703_vm3, %v1728_v60, %v1737_v12  ;;  %v1746_v29 = vor.u32 %v1745_v17, %v1742_v14  ;;  %v386_v30 = vrot.slane %v384_v21, 1  ;;  %v1751_v31 = vrot.slane %v1749_v22, 1  ;;  %5204 = vmatprep.subr.msk.bf16.mxu0 %vm547_vm0, %v5447_v1  ;;  %v5506_v14 = vld [vmem:[%s5362_s28 + $0x50] sm:$0xff]  }
  0x22   : > { %4723 = vmatprep.mubr.msk.bf16.mxu0 %vm492_vm2, %v1738_v24  ;;  %v392_v32 = vshll.u32 %v5442_v0, 16  ;;  %v1754_v6 = vrot.slane %v1752_v26, 2  ;;  %v1758_v36 = vshrl.u32 %v5461_v23, 16  ;;  %v1761_v37 = vshll.u32 %v5461_v23, 16 }
  0x23   : > { %v396_v38 = vshrl.u32 %v5442_v0, 16  ;;  %v1747_v40 = vsel %vm1703_vm3, %v1737_v12, %v1746_v29  ;;  %v387_v41 = vsel %vm343_vm1, %v382_v25, %v386_v30  ;;  %v390_v42 = vor.u32 %v388_v27, %v386_v30  ;;  %v5514_v25 = vld [vmem:[%s5362_s28 + $0x50] sm:$0xff]  }
  0x24   : > { %4572 = vmatmul.mubr.msk.bf16.gmra.mrb[4].mxu1 %vm492_vm2, %v379_v16  ;;  %v394_v43 = vrot.slane %v392_v32, 1  ;;  %v1755_v45 = vor.u32 %v1754_v6, %v1751_v31  ;;  %v1760_v46 = vrot.slane %v1758_v36, 1  ;;  %v1763_v47 = vrot.slane %v1761_v37, 2 }
  0x25   : > { %4575 = vmatprep.mubr.msk.bf16.mxu1 %vm492_vm2, %v387_v41  ;;  %v400_v50 = vshll.u32 %v5470_v35, 16  ;;  %v1767_v55 = vshrl.u32 %v5481_v44, 16  ;;  %v1770_v56 = vshll.u32 %v5481_v44, 16  ;;  %v404_v61 = vshrl.u32 %v5470_v35, 16  ;;  %v5524_v41 = vld [vmem:[%s5362_s28 + $0x58] sm:$0xff]  }
  0x26   : > { %v395_v52 = vsel %vm343_vm1, %v390_v42, %v394_v43  ;;  %v398_v53 = vor.u32 %v396_v38, %v394_v43  ;;  %v1756_v57 = vsel %vm1703_vm3, %v1746_v29, %v1755_v45  ;;  %v1764_v58 = vor.u32 %v1763_v47, %v1760_v46  ;;  %v5519_v29 = vld [vmem:[%s5362_s28 + $0x58] sm:$0xff]  }
  0x27   : > { %v402_v60 = vrot.slane %v400_v50, 1  ;;  %4724 = vmatmul.mubr.msk.bf16.gmra.mrb[4].mxu0 %vm492_vm2, %v1747_v40  ;;  %v1769_v3 = vrot.slane %v1767_v55, 1  ;;  %v1772_v4 = vrot.slane %v1770_v56, 2  ;;  %v408_v5 = vshll.u32 %v5486_v51, 16 }
  0x28   : > { %v412_v7 = vshrl.u32 %v5486_v51, 16  ;;  %4727 = vmatprep.mubr.msk.bf16.mxu0 %vm492_vm2, %v1756_v57  ;;  %v1776_v12 = vshrl.u32 %v5494_v62, 16  ;;  %v1779_v16 = vshll.u32 %v5494_v62, 16  ;;  %v416_v17 = vshll.u32 %v5497_v63, 16  ;;  %v2144_v57 = vld [vmem:[%s5362_s28 + $0x8] sm:$0xc] }
  0x29   : > { %v403_v11 = vsel %vm343_vm1, %v398_v53, %v402_v60  ;;  %v1773_v15 = vor.u32 %v1772_v4, %v1769_v3  ;;  %v410_v21 = vrot.slane %v408_v5, 1  ;;  %v1785_v22 = vshrl.u32 %v5506_v14, 16 }
  0x2a   : > { %v1788_v24 = vshll.u32 %v5506_v14, 16  ;;  %v1765_v26 = vsel %vm1703_vm3, %v1755_v45, %v1764_v58  ;;  %v406_v27 = vor.u32 %v404_v61, %v402_v60  ;;  %v1778_v30 = vrot.slane %v1776_v12, 1 }
  0x2b   : > { %v1781_v31 = vrot.slane %v1779_v16, 2  ;;  %v414_v32 = vor.u32 %v412_v7, %v410_v21  ;;  %v418_v6 = vrot.slane %v416_v17, 1  ;;  %v1774_v36 = vsel %vm1703_vm3, %v1764_v58, %v1773_v15  ;;  %v5538_v58 = vld [vmem:[%s5362_s28 + $0x60] sm:$0xff]  }
  0x2c   : > { %4576 = vmatmul.mubr.msk.bf16.gmra.mrb[8].mxu1 %vm492_vm2, %v395_v52  ;;  %v1787_v37 = vrot.slane %v1785_v22, 1  ;;  %v1790_v38 = vrot.slane %v1788_v24, 2  ;;  %v424_v40 = vshll.u32 %v5514_v25, 16  ;;  %v411_v42 = vsel %vm343_vm1, %v406_v27, %v410_v21 }
  0x2d   : > { %4579 = vmatprep.mubr.msk.bf16.mxu1 %vm492_vm2, %v403_v11  ;;  %v420_v43 = vshrl.u32 %v5497_v63, 16  ;;  %v1794_v45 = vshrl.u32 %v5519_v29, 16  ;;  %v1797_v46 = vshll.u32 %v5519_v29, 16  ;;  %v1782_v47 = vor.u32 %v1781_v31, %v1778_v30  ;;  %v5543_v11 = vld [vmem:[%s5362_s28 + $0x68] sm:$0xff]  }
  0x2e   : > { %v419_v50 = vsel %vm343_vm1, %v414_v32, %v418_v6  ;;  %v428_v52 = vshrl.u32 %v5514_v25, 16  ;;  %v432_v53 = vshll.u32 %v5524_v41, 16  ;;  %v1791_v55 = vor.u32 %v1790_v38, %v1787_v37  ;;  %v5560_v32 = vld [vmem:[%s5362_s28 + $0x70] sm:$0xff]  }
  0x2f   : > { %4728 = vmatmul.mubr.msk.bf16.gmra.mrb[8].mxu0 %vm492_vm2, %v1765_v26  ;;  %v426_v56 = vrot.slane %v424_v40, 1  ;;  %v422_v60 = vor.u32 %v420_v43, %v418_v6  ;;  %v1796_v61 = vrot.slane %v1794_v45, 1  ;;  %v1799_v3 = vrot.slane %v1797_v46, 2  ;;  %v5566_v40 = vld [vmem:[%s5362_s28 + $0x78] sm:$0xff]  }
  0x30   : > { %4731 = vmatprep.mubr.msk.bf16.mxu0 %vm492_vm2, %v1774_v36  ;;  %v1783_v4 = vsel %vm1703_vm3, %v1773_v15, %v1782_v47  ;;  %v434_v7 = vrot.slane %v432_v53, 1  ;;  %v1792_v12 = vsel %vm1703_vm3, %v1782_v47, %v1791_v55  ;;  %v4295_v16 = vcombine.low %v2144_v57, %v5380_v13 }
  0x31   : > { %v430_v5 = vor.u32 %v428_v52, %v426_v56  ;;  %v440_v17 = vshll.u32 %v5538_v58, 16  ;;  %v427_v21 = vsel %vm343_vm1, %v422_v60, %v426_v56  ;;  %v436_v22 = vshrl.u32 %v5524_v41, 16  ;;  %v5581_v56 = vld [vmem:[%s5362_s28 + $0x80] sm:$0xff]  }
  0x32   : > { %v5552_v15 = vor.u32 %v1799_v3, %v1796_v61  ;;  %v444_v26 = vshrl.u32 %v5538_v58, 16  ;;  %v448_v27 = vshll.u32 %v5543_v11, 16  ;;  %v2151_v13 = vrot.slane %v4295_v16, 2 }
  0x33   : > { %v435_v24 = vsel %vm343_vm1, %v430_v5, %v434_v7  ;;  %v2152_v30 = vrot.slane %v5387_v18, 2  ;;  %v442_v31 = vrot.slane %v440_v17, 1  ;;  %v438_v6 = vor.u32 %v436_v22, %v434_v7 }
  0x34   : > { %4580 = vmatmul.mubr.msk.bf16.gmra.mrb[12].mxu1 %vm492_vm2, %v411_v42  ;;  %v1801_v36 = vsel %vm1703_vm3, %v1791_v55, %v5552_v15  ;;  %v450_v38 = vrot.slane %v448_v27, 1  ;;  %v456_v18 = vshll.u32 %v5560_v32, 16  ;;  %v2154_v45 = vrot.slane %v5401_v28, 2  ;;  %v5611_v27 = vld [vmem:[%s5362_s28 + $0x90] ss:$0 sps:$4 sm:$0x11]  }
  0x35   : > { %4583 = vmatprep.mubr.msk.bf16.mxu1 %vm492_vm2, %v419_v50  ;;  %v446_v37 = vor.u32 %v444_v26, %v442_v31  ;;  %v2153_v42 = vsel %vm2150_vm4, %v2151_v13, %v2152_v30  ;;  %v443_v43 = vsel %vm343_vm1, %v438_v6, %v442_v31  ;;  %v452_v46 = vshrl.u32 %v5543_v11, 16 }
  0x36   : > { %v460_v50 = vshrl.u32 %v5560_v32, 16  ;;  %v464_v52 = vshll.u32 %v5566_v40, 16  ;;  %v2156_v53 = vrot.slane %v5407_v34, 2  ;;  %v458_v55 = vrot.slane %v456_v18, 1  ;;  %v5594_v34 = vld [vmem:[%s6383_s1 + $0xe] sm:$0x3] }
  0x37   : > { %4732 = vmatmul.mubr.msk.bf16.gmra.mrb[12].mxu0 %vm492_vm2, %v1783_v4  ;;  %v451_v47 = vsel %vm343_vm1, %v446_v37, %v450_v38  ;;  %v2682_v28 = vsel %vm547_vm0, %v5447_v1, 0  ;;  %v454_v57 = vor.u32 %v452_v46, %v450_v38  ;;  %v2155_v60 = vsel %vm2150_vm4, %v2152_v30, %v2154_v45  ;;  %v5588_v4 = vld [vmem:[%s5362_s28 + $0x88] sm:$0xff]  }
  0x38   : > { %4735 = vmatprep.mubr.msk.bf16.mxu0 %vm492_vm2, %v1792_v12  ;;  %v462_v61 = vor.u32 %v460_v50, %v458_v55  ;;  %v466_v3 = vrot.slane %v464_v52, 1  ;;  %v2157_v5 = vsel %vm2150_vm4, %v2154_v45, %v2156_v53  ;;  %v472_v7 = vshll.u32 %v5581_v56, 16 }
  0x39   : > { %v459_v1 = vsel %vm343_vm1, %v454_v57, %v458_v55  ;;  %v2158_v12 = vrot.slane %v5425_v49, 2  ;;  %v468_v16 = vshrl.u32 %v5566_v40, 16  ;;  %v480_v22 = vshll.u32 %v5588_v4, 16  ;;  %v5638_v55 = vld [vmem:[%s5362_s28 + $0x60] sm:$0xff]   ;;  %v5657_v57 = vld [vmem:[%s5362_s28 + $0x68] sm:$0xff]  }
  0x3a   : > { %v467_v17 = vsel %vm343_vm1, %v462_v61, %v466_v3  ;;  %v474_v26 = vrot.slane %v472_v7, 1  ;;  %v488_v37 = vshll.u32 %v5611_v27, 16  ;;  %v2162_v38 = vrot.slane %v5461_v23, 2  ;;  %v5675_v7 = vld [vmem:[%s5362_s28 + $0x78] sm:$0xff]  }
  0x3b   : > { %v470_v49 = vor.u32 %v468_v16, %v466_v3  ;;  %v2159_v13 = vsel %vm2150_vm4, %v2156_v53, %v2158_v12  ;;  %v482_v31 = vrot.slane %v480_v22, 1  ;;  %v2164_v18 = vrot.slane %v5481_v44, 2  ;;  %v5691_v22 = vld [vmem:[%s5362_s28 + $0x88] sm:$0xff]  }
  0x3c   : > { %4584 = vmatmul.mubr.msk.bf16.gmra.mrb[16].mxu1 %vm492_vm2, %v427_v21  ;;  %v476_v21 = vshrl.u32 %v5581_v56, 16  ;;  %v490_v45 = vrot.slane %v488_v37, 1  ;;  %v2166_v23 = vrot.slane %v5494_v62, 2  ;;  %v2168_v44 = vrot.slane %v5506_v14, 2 }
  0x3d   : > { %4587 = vmatprep.mubr.msk.bf16.mxu1 %vm492_vm2, %v435_v24  ;;  %v2160_v24 = vrot.slane %v5437_v59, 2  ;;  %v475_v59 = vsel %vm343_vm1, %v470_v49, %v474_v26  ;;  %v2170_v62 = vrot.slane %v5519_v29, 2  ;;  %v1043_v14 = vsel %vm547_vm0, %v5413_v39, 0 }
  0x3e   : > { %v478_v30 = vor.u32 %v476_v21, %v474_v26  ;;  %v2167_v52 = vsel %vm2150_vm4, %v2164_v18, %v2166_v23  ;;  %v2169_v53 = vsel %vm2150_vm4, %v2166_v23, %v2168_v44  ;;  %v2174_v61 = vrot.slane %v5657_v57, 2  ;;  %v5695_v26 = vld [vmem:[%s5362_s28 + $0x90] sm:$0xff]  }
  0x3f   : > { %4736 = vmatmul.mubr.msk.bf16.gmra.mrb[16].mxu0 %vm492_vm2, %v1801_v36  ;;  %v2161_v6 = vsel %vm2150_vm4, %v2158_v12, %v2160_v24  ;;  %v484_v36 = vshrl.u32 %v5588_v4, 16  ;;  %v2163_v46 = vsel %vm2150_vm4, %v2160_v24, %v2162_v38  ;;  %v2171_v29 = vsel %vm2150_vm4, %v2168_v44, %v2170_v62  ;;  %v5679_v12 = vld [vmem:[%s5362_s28 + $0x80] sm:$0xff]  }
  0x40   : > { %4757 = vmatprep.mubr.msk.bf16.mxu0 %vm492_vm2, %v2153_v42  ;;  %v483_v42 = vsel %vm343_vm1, %v478_v30, %v482_v31  ;;  %v2178_v16 = vrot.slane %v5675_v7, 2  ;;  %v2182_v49 = vrot.slane %v5691_v22, 2  ;;  %v2458_v30 = vld [vmem:[%s5362_s28 + $0x10] sm:$0xc] }
  0x44   : > { %4588 = vmatmul.mubr.msk.bf16.gmra.mrb[20].mxu1 %vm492_vm2, %v443_v43  ;;  %v486_v43 = vor.u32 %v484_v36, %v482_v31  ;;  %v5705_v31 = vld [vmem:[%s5362_s28 + $0x14] sm:$0xf] }
  0x45   : > { %4591 = vmatprep.mubr.msk.bf16.mxu1 %vm492_vm2, %v451_v47  ;;  %v2165_v47 = vsel %vm2150_vm4, %v2162_v38, %v2164_v18  ;;  %v5715_v37 = vcombine.low %v2458_v30, %v5705_v31  ;;  %v5718_v38 = vld [vmem:[%s5362_s28 + $0x18] sm:$0xff]  }
  0x46   : > { %v491_v50 = vsel %vm343_vm1, %v486_v43, %v490_v45  ;;  %v2591_v43 = vrot.slane %v5718_v38, 2 }
  0x47   : > { %4758 = vmatmul.mubr.msk.bf16.vlgmr.msra.gmra.mrb[0].mxu0 %vm492_vm2, %v2155_v60  ;;  %v5663_v60 = vld [vmem:[%s5362_s28 + $0x70] sm:$0xff]   ;;  %v2590_v18 = vrot.slane %v5715_v37, 2 }
  0x48   : > { %4794 = vmatpush3.bf16.msra.mxu0 %v2682_v28  ;;  %4761 = vmatprep.mubr.msk.bf16.mxu0 %vm492_vm2, %v2157_v5  ;;  %v2172_v28 = vrot.slane %v5638_v55, 2  ;;  %v2176_v3 = vrot.slane %v5663_v60, 2 }
  0x49   : > { %5205 = vmatprep.subr.msk.bf16.mxu0 %vm547_vm0, %v5594_v34 }
  0x4a   : > { %v2173_v39 = vsel %vm2150_vm4, %v2170_v62, %v2172_v28  ;;  %v2175_v5 = vsel %vm2150_vm4, %v2172_v28, %v2174_v61  ;;  %v2179_v21 = vsel %vm2150_vm4, %v2176_v3, %v2178_v16  ;;  %v3129_v62 = vsel %vm547_vm0, %v5594_v34, 0  ;;  %v5753_v28 = vld [vmem:[%s5362_s28 + $0x38] sm:$0xff]  }
  0x4c   : > { %4592 = vmatmul.mubr.msk.bf16.gmra.mrb[24].mxu1 %vm492_vm2, %v459_v1  ;;  %v2177_v1 = vsel %vm2150_vm4, %v2174_v61, %v2176_v3  ;;  %v2599_v61 = vrot.slane %v5753_v28, 2  ;;  %v5772_v3 = vld [vmem:[%s5362_s28 + $0x40] sm:$0xff]  }
  0x4d   : > { %4595 = vmatprep.mubr.msk.bf16.mxu1 %vm492_vm2, %v467_v17  ;;  %v2180_v17 = vrot.slane %v5679_v12, 2 }
  0x4f   : > { %4762 = vmatmul.mubr.msk.bf16.gmra.mrb[4].mxu0 %vm492_vm2, %v2159_v13  ;;  %v2181_v24 = vsel %vm2150_vm4, %v2178_v16, %v2180_v17  ;;  %v2184_v13 = vrot.slane %v5695_v26, 2  ;;  %v944_v16 = vld [vmem:[%s5362_s28] sm:$0xe] }
  0x50   : > { %4765 = vmatprep.mubr.msk.bf16.mxu0 %vm492_vm2, %v2161_v6  ;;  %v2183_v6 = vsel %vm2150_vm4, %v2180_v17, %v2182_v49  ;;  %v2601_v17 = vrot.slane %v5772_v3, 2 }
  0x51   : > { %v2185_v36 = vsel %vm2150_vm4, %v2182_v49, %v2184_v13 }
  0x52   : > { %v2602_v49 = vsel %vm2150_vm4, %v2599_v61, %v2601_v17 }
  0x54   : > { %4596 = vmatmul.mubr.msk.bf16.gmra.mrb[28].mxu1 %vm492_vm2, %v475_v59  ;;  %v5711_v59 = vld [vmem:[%s5362_s28 + $0x98] ss:$0 sps:$4 sm:$0x33]  }
  0x55   : > { %4599 = vmatprep.mubr.msk.bf16.mxu1 %vm492_vm2, %v483_v42  ;;  %v2186_v42 = vrot.slane %v5711_v59, 2 }
  0x57   : > { %4766 = vmatmul.mubr.msk.bf16.gmra.mrb[8].mxu0 %vm492_vm2, %v2163_v46  ;;  %v2187_v45 = vsel %vm2150_vm4, %v2184_v13, %v2186_v42  ;;  %v5731_v46 = vld [vmem:[%s5362_s28 + $0x20] sm:$0xff]   ;;  %v5790_v13 = vld [vmem:[%s5362_s28 + $0x50] sm:$0xff]  }
  0x58   : > { %4769 = vmatprep.mubr.msk.bf16.mxu0 %vm492_vm2, %v2165_v47  ;;  %v2592_v47 = vsel %vm2150_vm4, %v2590_v18, %v2591_v43  ;;  %v2593_v23 = vrot.slane %v5731_v46, 2  ;;  %v2605_v42 = vrot.slane %v5790_v13, 2 }
  0x5c   : > { %4600 = vmatmul.mubr.msk.bf16.gmra.mrb[32].mxu1 %vm492_vm2, %v491_v50  ;;  %v5735_v50 = vld [vmem:[%s5362_s28 + $0x28] sm:$0xff]  }
  0x5d   : > { %4605 = vmatprep.mubr.msk.bf16.mxu1 %vm492_vm2, %v5372_v9  ;;  %v5649_v9 = vld [vmem:[%s6383_s1 + $0x6] sm:$0x3]  ;;  %v2595_v44 = vrot.slane %v5735_v50, 2 }
  0x5f   : > { %4770 = vmatmul.mubr.msk.bf16.gmra.mrb[12].mxu0 %vm492_vm2, %v2167_v52  ;;  %v2594_v52 = vsel %vm2150_vm4, %v2591_v43, %v2593_v23 }
  0x60   : > { %4773 = vmatprep.mubr.msk.bf16.mxu0 %vm492_vm2, %v2169_v53  ;;  %v5747_v53 = vld [vmem:[%s5362_s28 + $0x30] sm:$0xff]  }
  0x64   : > { %4606 = vmatmul.mubr.msk.bf16.vlgmr.msra.gmra.mrb[0].mxu1 %vm492_vm2, %v5375_v10 }
  0x65   : > { %4609 = vmatprep.mubr.msk.bf16.mxu1 %vm492_vm2, %v5390_v19  ;;  %4642 = vmatpush3.bf16.msra.mxu1 %v1043_v14  ;;  %v2596_v14 = vsel %vm2150_vm4, %v2593_v23, %v2595_v44  ;;  %v956_v23 = vrot.slane %v5404_v33, 1 }
  0x66   : > { %5200 = vmatprep.subr.msk.bf16.mxu1 %vm547_vm0, %v5649_v9 }
  0x67   : > { %4774 = vmatmul.mubr.msk.bf16.gmra.mrb[16].mxu0 %vm492_vm2, %v2171_v29  ;;  %v5758_v29 = vld [vmem:[%s6383_s1 + $0x10] sm:$0x3] }
  0x68   : > { %4777 = vmatprep.mubr.msk.bf16.mxu0 %vm492_vm2, %v2173_v39  ;;  %v2597_v39 = vrot.slane %v5747_v53, 2 }
  0x6a   : > { %v2598_v34 = vsel %vm2150_vm4, %v2595_v44, %v2597_v39 }
  0x6c   : > { %4610 = vmatmul.mubr.msk.bf16.gmra.mrb[4].mxu1 %vm492_vm2, %v5404_v33 }
  0x6d   : > { %4613 = vmatprep.mubr.msk.bf16.mxu1 %vm492_vm2, %v5422_v48 }
  0x6f   : > { %4778 = vmatmul.mubr.msk.bf16.gmra.mrb[20].mxu0 %vm492_vm2, %v2175_v5  ;;  %v2600_v5 = vsel %vm2150_vm4, %v2597_v39, %v2599_v61  ;;  %v1482_v39 = vsel %vm547_vm0, %v5649_v9, 0  ;;  %v5301_v61 = vmov 0   ;;  %v5282_v9 = vld [vmem:[%s6383_s1 + $0x8] sm:$0x3] }
  0x70   : > { %4781 = vmatprep.mubr.msk.bf16.mxu0 %vm492_vm2, %v2177_v1  ;;  %v5776_v1 = vld [vmem:[%s5362_s28 + $0x48] sm:$0xff]   ;;  %5218 = vset.pattern.permute.xlu0 %v5301_v61 }
  0x71   : > { %5219 = vset.pattern.permute.xlu1 %v5301_v61  ;;  %v3700_v61 = vld [vmem:[%s6384_s2 + $0x30] sm:$0xff] }
  0x74   : > { %4614 = vmatmul.mubr.msk.bf16.gmra.mrb[8].mxu1 %vm492_vm2, %v5431_v54 }
  0x75   : > { %4617 = vmatprep.mubr.msk.bf16.mxu1 %vm492_vm2, %v5442_v0 }
  0x77   : > { %4782 = vmatmul.mubr.msk.bf16.gmra.mrb[24].mxu0 %vm492_vm2, %v2179_v21  ;;  %v4217_v21 = vcombine.low %v944_v16, %v5369_v8  ;;  %v5795_v8 = vld [vmem:[%s5362_s28 + $0x58] sm:$0xff]   ;;  %v5828_v16 = vld [vmem:[%s5362_s28 + $0x70] sm:$0xff]  }
  0x78   : > { %4785 = vmatprep.mubr.msk.bf16.mxu0 %vm492_vm2, %v2181_v24  ;;  %v2603_v24 = vrot.slane %v5776_v1, 2  ;;  %v2607_v43 = vrot.slane %v5795_v8, 2 }
  0x79   : > { %v951_v30 = vrot.slane %v4217_v21, 1 }
  0x7a   : > { %v2608_v44 = vsel %vm2150_vm4, %v2605_v42, %v2607_v43 }
  0x7c   : > { %4618 = vmatmul.mubr.msk.bf16.gmra.mrb[12].mxu1 %vm492_vm2, %v5470_v35 }
  0x7d   : > { %4621 = vmatprep.mubr.msk.bf16.mxu1 %vm492_vm2, %v5486_v51 }
  0x7f   : > { %4786 = vmatmul.mubr.msk.bf16.gmra.mrb[28].mxu0 %vm492_vm2, %v2183_v6  ;;  %v952_v6 = vrot.slane %v5375_v10, 1  ;;  %v954_v10 = vrot.slane %v5390_v19, 1 }
  0x80   : > { %4789 = vmatprep.mubr.msk.bf16.mxu0 %vm492_vm2, %v2185_v36  ;;  %v2604_v36 = vsel %vm2150_vm4, %v2601_v17, %v2603_v24  ;;  %v960_v17 = vrot.slane %v5431_v54, 1  ;;  %v3696_v54 = vld [vmem:[%s6384_s2 + $0x10] sm:$0xff] }
  0x81   : > { %v953_v18 = vsel %vm950_vm5, %v951_v30, %v952_v6  ;;  %v957_v19 = vsel %vm950_vm5, %v954_v10, %v956_v23  ;;  %v2613_v30 = vrot.slane %v5828_v16, 2  ;;  %3742 = vperm.xlu1 %5219, %v3696_v54   ;;  %v3702_v54 = vld [vmem:[%s6384_s2 + $0x40] sm:$0xff] }
  0x84   : > { %4622 = vmatmul.mubr.msk.bf16.gmra.mrb[16].mxu1 %vm492_vm2, %v5497_v63 }
  0x85   : > { %4625 = vmatprep.mubr.msk.bf16.mxu1 %vm492_vm2, %v5514_v25 }
  0x87   : > { %4790 = vmatmul.mubr.msk.bf16.gmra.mrb[32].mxu0 %vm492_vm2, %v2187_v45  ;;  %v2606_v45 = vsel %vm2150_vm4, %v2603_v24, %v2605_v42  ;;  %v5837_v24 = vld [vmem:[%s5362_s28 + $0x78] sm:$0xff]   ;;  %v3695_v42 = vld [vmem:[%s6384_s2 + $0x8] sm:$0xff] }
  0x88   : > { %4795 = vmatprep.mubr.msk.bf16.mxu0 %vm492_vm2, %v2592_v47  ;;  %v5808_v47 = vld [vmem:[%s5362_s28 + $0x60] sm:$0xff]  }
  0x8c   : > { %4626 = vmatmul.mubr.msk.bf16.gmra.mrb[20].mxu1 %vm492_vm2, %v5524_v41 }
  0x8d   : > { %4629 = vmatprep.mubr.msk.bf16.mxu1 %vm492_vm2, %v5538_v58 }
  0x8f   : > { %4796 = vmatmul.mubr.msk.bf16.vlgmr.msra.gmra.mrb[0].mxu0 %vm492_vm2, %v2594_v52  ;;  %v5813_v52 = vld [vmem:[%s5362_s28 + $0x68] sm:$0xff]  }
  0x90   : > { %4832 = vmatpush3.bf16.msra.mxu0 %v3129_v62  ;;  %4799 = vmatprep.mubr.msk.bf16.mxu0 %vm492_vm2, %v2596_v14  ;;  %v955_v62 = vsel %vm950_vm5, %v952_v6, %v954_v10  ;;  %v2609_v14 = vrot.slane %v5808_v47, 2  ;;  %v2611_v33 = vrot.slane %v5813_v52, 2  ;;  %v5859_v10 = vld [vmem:[%s5362_s28 + $0x80] sm:$0xff]  }
  0x91   : > { %5206 = vmatprep.subr.msk.bf16.mxu0 %vm547_vm0, %v5758_v29 }
  0x92   : > { %v2612_v21 = vsel %vm2150_vm4, %v2609_v14, %v2611_v33 }
  0x94   : > { %4630 = vmatmul.mubr.msk.bf16.gmra.mrb[24].mxu1 %vm492_vm2, %v5543_v11 }
  0x95   : > { %4633 = vmatprep.mubr.msk.bf16.mxu1 %vm492_vm2, %v5560_v32 }
  0x97   : > { %4800 = vmatmul.mubr.msk.bf16.gmra.mrb[4].mxu0 %vm492_vm2, %v2598_v34  ;;  %v958_v34 = vrot.slane %v5422_v48, 1 }
  0x98   : > { %4803 = vmatprep.mubr.msk.bf16.mxu0 %vm492_vm2, %v2600_v5  ;;  %v2610_v5 = vsel %vm2150_vm4, %v2607_v43, %v2609_v14  ;;  %v2614_v43 = vsel %vm2150_vm4, %v2611_v33, %v2613_v30  ;;  %v3698_v14 = vld [vmem:[%s6384_s2 + $0x20] sm:$0xff]  ;;  %v3699_v33 = vld [vmem:[%s6384_s2 + $0x28] sm:$0xff] }
  0x99   : > { %v959_v48 = vsel %vm950_vm5, %v956_v23, %v958_v34  ;;  %v961_v6 = vsel %vm950_vm5, %v958_v34, %v960_v17  ;;  %v966_v34 = vrot.slane %v5486_v51, 1  ;;  %v3701_v51 = vld [vmem:[%s6384_s2 + $0x38] sm:$0xff] }
  0x9c   : > { %4634 = vmatmul.mubr.msk.bf16.gmra.mrb[28].mxu1 %vm492_vm2, %v5566_v40 }
  0x9d   : > { %4637 = vmatprep.mubr.msk.bf16.mxu1 %vm492_vm2, %v5581_v56 }
  0x9f   : > { %4804 = vmatmul.mubr.msk.bf16.gmra.mrb[8].mxu0 %vm492_vm2, %v2602_v49  ;;  %v3694_v49 = vld [vmem:[%s6384_s2] sm:$0xff] }
  0xa0   : > { %4807 = vmatprep.mubr.msk.bf16.mxu0 %vm492_vm2, %v2604_v36  ;;  %3732 = vperm.xlu0 %5218, %v3694_v49   ;;  %v2615_v36 = vrot.slane %v5837_v24, 2 }
  0xa2   : > { %v2616_v23 = vsel %vm2150_vm4, %v2613_v30, %v2615_v36 }
  0xa4   : > { %4638 = vmatmul.mubr.msk.bf16.gmra.mrb[32].mxu1 %vm492_vm2, %v5588_v4  ;;  %3737 = vperm.xlu0 %5218, %v3695_v42   ;;  %v2908_v42 = vshll.u32 %v5715_v37, 16 }
  0xa5   : > { %4643 = vmatprep.mubr.msk.bf16.mxu1 %vm492_vm2, %v953_v18  ;;  %v962_v18 = vrot.slane %v5442_v0, 1  ;;  %v3697_v0 = vld [vmem:[%s6384_s2 + $0x18] sm:$0xff] }
  0xa6   : > { %3747 = vperm.xlu1 %5219, %v3697_v0  }
  0xa7   : > { %4808 = vmatmul.mubr.msk.bf16.gmra.mrb[12].mxu0 %vm492_vm2, %v2606_v45  ;;  %v964_v45 = vrot.slane %v5470_v35, 1  ;;  %v2617_v35 = vrot.slane %v5859_v10, 2 }
  0xa8   : > { %4811 = vmatprep.mubr.msk.bf16.mxu0 %vm492_vm2, %v2608_v44  ;;  %v5864_v44 = vld [vmem:[%s5362_s28 + $0x88] sm:$0xff]   ;;  %3752 = vperm.xlu0 %5218, %v3698_v14   ;;  %v5278_v14 = vld [vmem:[%s5362_s28 + $0xa0] ss:$0 sps:$4 sm:$0x33]  }
  0xa9   : > { %v967_v49 = vsel %vm950_vm5, %v964_v45, %v966_v34 }
  0xaa   : > { %3757 = vperm.xlu1 %5219, %v3699_v33   ;;  %v2910_v33 = vrot.slane %v2908_v42, 3  ;;  %v3708_v42 = vld [vmem:[%s6384_s2 + $0x70] sm:$0xff] }
  0xac   : > { %4644 = vmatmul.mubr.msk.bf16.vlgmr.msra.gmra.mrb[0].mxu1 %vm492_vm2, %v955_v62  ;;  %v963_v62 = vsel %vm950_vm5, %v960_v17, %v962_v18  ;;  %v5889_v17 = vld [vmem:[%s5362_s28 + $0x90] sm:$0xff]   ;;  %3762 = vperm.xlu0 %5218, %v3700_v61  }
  0xad   : > { %4647 = vmatprep.mubr.msk.bf16.mxu1 %vm492_vm2, %v957_v19  ;;  %4680 = vmatpush3.bf16.msra.mxu1 %v1482_v39  ;;  %v965_v19 = vsel %vm950_vm5, %v962_v18, %v964_v45  ;;  %v2619_v39 = vrot.slane %v5864_v44, 2  ;;  %v2913_v18 = vshrl.u32 %v5718_v38, 16  ;;  %v3703_v45 = vld [vmem:[%s6384_s2 + $0x48] sm:$0xff] }
  0xae   : > { %5202 = vmatprep.subr.msk.bf16.mxu1 %vm547_vm0, %v5282_v9  ;;  %v968_v9 = vrot.slane %v5497_v63, 1  ;;  %v2621_v63 = vrot.slane %v5889_v17, 2  ;;  %3767 = vperm.xlu1 %5219, %v3701_v51   ;;  %v2925_v51 = vshll.u32 %v5731_v46, 16 }
  0xaf   : > { %4812 = vmatmul.mubr.msk.bf16.gmra.mrb[16].mxu0 %vm492_vm2, %v2610_v5  ;;  %v2618_v5 = vsel %vm2150_vm4, %v2615_v36, %v2617_v35  ;;  %v2905_v36 = vshrl.u32 %v5715_v37, 16  ;;  %v2915_v61 = vrot.slane %v2913_v18, 2  ;;  %v974_v18 = vrot.slane %v5538_v58, 1  ;;  %v3709_v58 = vld [vmem:[%s6384_s2 + $0x78] sm:$0xff] }
  0xb0   : > { %4815 = vmatprep.mubr.msk.bf16.mxu0 %vm492_vm2, %v2612_v21  ;;  %v5893_v21 = vld [vmem:[%s5362_s28 + $0x98] sm:$0xff]   ;;  %v969_v30 = vsel %vm950_vm5, %v966_v34, %v968_v9  ;;  %3772 = vperm.xlu0 %5218, %v3702_v54   ;;  %v2622_v37 = vsel %vm2150_vm4, %v2619_v39, %v2621_v63 }
  0xb2   : > { %3777 = vperm.xlu1 %5219, %v3703_v45  }
  0xb4   : > { %4648 = vmatmul.mubr.msk.bf16.gmra.mrb[4].mxu1 %vm492_vm2, %v959_v48  ;;  %v2620_v48 = vsel %vm2150_vm4, %v2617_v35, %v2619_v39  ;;  %v972_v35 = vrot.slane %v5524_v41, 1  ;;  %v3706_v39 = vld [vmem:[%s6384_s2 + $0x60] sm:$0xff]  ;;  %v2625_v41 = vrot.slane %v5278_v14, 2 }
  0xb5   : > { %4651 = vmatprep.mubr.msk.bf16.mxu1 %vm492_vm2, %v961_v6  ;;  %v2623_v6 = vrot.slane %v5893_v21, 2 }
  0xb7   : > { %4816 = vmatmul.mubr.msk.bf16.gmra.mrb[20].mxu0 %vm492_vm2, %v2614_v43  ;;  %v2916_v43 = vshll.u32 %v5718_v38, 16  ;;  %v2624_v0 = vsel %vm2150_vm4, %v2621_v63, %v2623_v6  ;;  %v2931_v63 = vshrl.u32 %v5735_v50, 16 }
  0xb8   : > { %4819 = vmatprep.mubr.msk.bf16.mxu0 %vm492_vm2, %v2616_v23  ;;  %v3704_v23 = vld [vmem:[%s6384_s2 + $0x50] sm:$0xff] }
  0xb9   : > { %v2918_v34 = vrot.slane %v2916_v43, 3  ;;  %3782 = vperm.xlu0 %5218, %v3704_v23   ;;  %v2626_v43 = vsel %vm2150_vm4, %v2623_v6, %v2625_v41  ;;  %v2927_v23 = vrot.slane %v2925_v51, 3  ;;  %v3710_v6 = vld [vmem:[%s6384_s2 + $0x80] sm:$0xff]  ;;  %v3712_v41 = vld [vmem:[%s6384_s2 + $0x90] sm:$0xff] }
  0xbc   : > { %4652 = vmatmul.mubr.msk.bf16.gmra.mrb[8].mxu1 %vm492_vm2, %v963_v62  ;;  %v970_v62 = vrot.slane %v5514_v25, 1  ;;  %v3705_v25 = vld [vmem:[%s6384_s2 + $0x58] sm:$0xff] }
  0xbd   : > { %4655 = vmatprep.mubr.msk.bf16.mxu1 %vm492_vm2, %v965_v19  ;;  %v2907_v19 = vrot.slane %v2905_v36, 2  ;;  %3787 = vperm.xlu1 %5219, %v3705_v25   ;;  %v3707_v36 = vld [vmem:[%s6384_s2 + $0x68] sm:$0xff]  ;;  %v2952_v25 = vshll.u32 %v5753_v28, 16 }
  0xbe   : > { %3792 = vperm.xlu0 %5218, %v3706_v39   ;;  %v3711_v39 = vld [vmem:[%s6384_s2 + $0x88] sm:$0xff] }
  0xbf   : > { %4820 = vmatmul.mubr.msk.bf16.gmra.mrb[24].mxu0 %vm492_vm2, %v2618_v5  ;;  %v971_v5 = vsel %vm950_vm5, %v968_v9, %v970_v62  ;;  %v2911_v54 = vor.u32 %v2910_v33, %v2907_v19  ;;  %v2919_v9 = vor.u32 %v2918_v34, %v2915_v61  ;;  %v975_v19 = vsel %vm950_vm5, %v972_v35, %v974_v18 }
  0xc0   : > { %4823 = vmatprep.mubr.msk.bf16.mxu0 %vm492_vm2, %v2620_v48  ;;  %v973_v48 = vsel %vm950_vm5, %v970_v62, %v972_v35  ;;  %v976_v62 = vrot.slane %v5543_v11, 1  ;;  %v2940_v61 = vshrl.u32 %v5747_v53, 16  ;;  %v2943_v34 = vshll.u32 %v5747_v53, 16 }
  0xc1   : > { %3797 = vperm.xlu1 %5219, %v3707_v36   ;;  %v2949_v35 = vshrl.u32 %v5753_v28, 16 }
  0xc2   : > { %3802 = vperm.xlu0 %5218, %v3708_v42   ;;  %v977_v33 = vsel %vm950_vm5, %v974_v18, %v976_v62  ;;  %v2942_v51 = vrot.slane %v2940_v61, 2  ;;  %v2954_v18 = vrot.slane %v2952_v25, 3  ;;  %v984_v61 = vrot.slane %v5588_v4, 1 }
  0xc3   : > { %v2951_v42 = vrot.slane %v2949_v35, 2 }
  0xc4   : > { %4656 = vmatmul.mubr.msk.bf16.gmra.mrb[12].mxu1 %vm492_vm2, %v967_v49  ;;  %v2922_v49 = vshrl.u32 %v5731_v46, 16 }
  0xc5   : > { %4659 = vmatprep.mubr.msk.bf16.mxu1 %vm492_vm2, %v969_v30  ;;  %v2934_v30 = vshll.u32 %v5735_v50, 16  ;;  %3807 = vperm.xlu1 %5219, %v3709_v58   ;;  %v982_v58 = vrot.slane %v5581_v56, 1  ;;  %v3717_v56 = vld [vmem:[%s6384_s2 + $0xb8] sm:$0xff] }
  0xc6   : > { %v2924_v45 = vrot.slane %v2922_v49, 2  ;;  %3812 = vperm.xlu0 %5218, %v3710_v6  }
  0xc7   : > { %4824 = vmatmul.mubr.msk.bf16.gmra.mrb[28].mxu0 %vm492_vm2, %v2622_v37  ;;  %v2920_v37 = vsel %vm2903_vm6, %v2911_v54, %v2919_v9  ;;  %v2936_v14 = vrot.slane %v2934_v30, 3  ;;  %v2945_v54 = vrot.slane %v2943_v34, 3  ;;  %v3443_v30 = vsel %vm547_vm0, %v5758_v29, 0  ;;  %v3714_v29 = vld [vmem:[%s6384_s2 + $0xa0] sm:$0xff] }
  0xc8   : > { %4827 = vmatprep.mubr.msk.bf16.mxu0 %vm492_vm2, %v2624_v0  ;;  %v2933_v0 = vrot.slane %v2931_v63, 2  ;;  %v2928_v11 = vor.u32 %v2927_v23, %v2924_v45  ;;  %v980_v63 = vrot.slane %v5566_v40, 1  ;;  %v3713_v40 = vld [vmem:[%s6384_s2 + $0x98] sm:$0xff]  ;;  %v985_v4 = vsel %vm950_vm5, %v982_v58, %v984_v61 }
  0xc9   : > { %3817 = vperm.xlu1 %5219, %v3711_v39   ;;  %v2946_v45 = vor.u32 %v2945_v54, %v2942_v51  ;;  %v2985_v54 = vshrl.u32 %v5795_v8, 16 }
  0xca   : > { %v2929_v49 = vsel %vm2903_vm6, %v2919_v9, %v2928_v11  ;;  %3822 = vperm.xlu0 %5218, %v3712_v41   ;;  %v2961_v9 = vshll.u32 %v5772_v3, 16  ;;  %v983_v39 = vsel %vm950_vm5, %v980_v63, %v982_v58  ;;  %v2997_v58 = vshll.u32 %v5808_v47, 16 }
  0xcc   : > { %4660 = vmatmul.mubr.msk.bf16.gmra.mrb[16].mxu1 %vm492_vm2, %v971_v5  ;;  %v2937_v5 = vor.u32 %v2936_v14, %v2933_v0  ;;  %v2970_v0 = vshll.u32 %v5776_v1, 16  ;;  %v3715_v14 = vld [vmem:[%s6384_s2 + $0xa8] sm:$0xff] }
  0xcd   : > { %4663 = vmatprep.mubr.msk.bf16.mxu1 %vm492_vm2, %v973_v48  ;;  %v978_v48 = vrot.slane %v5560_v32, 1  ;;  %v2958_v32 = vshrl.u32 %v5772_v3, 16  ;;  %3827 = vperm.xlu1 %5219, %v3713_v40   ;;  %v5283_v40 = vld [vmem:[%s5362_s28 + $0x10] sm:$0xff]  }
  0xce   : > { %v2938_v36 = vsel %vm2903_vm6, %v2928_v11, %v2937_v5  ;;  %3832 = vperm.xlu0 %5218, %v3714_v29   ;;  %v2963_v11 = vrot.slane %v2961_v9, 3  ;;  %v2972_v25 = vrot.slane %v2970_v0, 3  ;;  %v1390_v9 = vrot.slane %v5393_v20, 1 }
  0xcf   : > { %4828 = vmatmul.mubr.msk.bf16.gmra.mrb[32].mxu0 %vm492_vm2, %v2626_v43  ;;  %v979_v43 = vsel %vm950_vm5, %v976_v62, %v978_v48  ;;  %v981_v23 = vsel %vm950_vm5, %v978_v48, %v980_v63  ;;  %v2967_v62 = vshrl.u32 %v5776_v1, 16  ;;  %v2960_v6 = vrot.slane %v2958_v32, 2 }
  0xd0   : > { %4833 = vmatprep.mubr.msk.bf16.mxu0 %vm492_vm2, %v2920_v37  ;;  %v2955_v37 = vor.u32 %v2954_v18, %v2951_v42  ;;  %v2976_v48 = vshrl.u32 %v5790_v13, 16  ;;  %v2988_v63 = vshll.u32 %v5795_v8, 16  ;;  %v986_v18 = vrot.slane %v5611_v27, 1  ;;  %v3722_v27 = vld [vmem:[%s6384_s2 + $0xe0] sm:$0xff] }
  0xd1   : > { %v2969_v35 = vrot.slane %v2967_v62, 2  ;;  %3837 = vperm.xlu1 %5219, %v3715_v14   ;;  %v2964_v41 = vor.u32 %v2963_v11, %v2960_v6  ;;  %v1391_v29 = vrot.slane %v5283_v40, 1  ;;  %v3003_v11 = vshrl.u32 %v5813_v52, 16 }
  0xd2   : > { %v2956_v34 = vsel %vm2903_vm6, %v2946_v45, %v2955_v37  ;;  %v2990_v62 = vrot.slane %v2988_v63, 3  ;;  %v987_v20 = vsel %vm950_vm5, %v984_v61, %v986_v18  ;;  %v3723_v61 = vld [vmem:[%s6384_s2 + $0xe8] sm:$0xff]  ;;  %v3725_v63 = vld [vmem:[%s6384_s2 + $0xf8] sm:$0xff]  ;;  %v3012_v18 = vshrl.u32 %v5828_v16, 16 }
  0xd3   : > { %v2973_v51 = vor.u32 %v2972_v25, %v2969_v35  ;;  %v2965_v42 = vsel %vm2903_vm6, %v2955_v37, %v2964_v41  ;;  %v3721_v37 = vld [vmem:[%s6384_s2 + $0xd8] sm:$0xff]  ;;  %v1392_v14 = vsel %vm950_vm5, %v1390_v9, %v1391_v29  ;;  %v3021_v9 = vshrl.u32 %v5837_v24, 16 }
  0xd4   : > { %4664 = vmatmul.mubr.msk.bf16.gmra.mrb[20].mxu1 %vm492_vm2, %v975_v19  ;;  %v3716_v19 = vld [vmem:[%s6384_s2 + $0xb0] sm:$0xff]  ;;  %v5284_v35 = vld [vmem:[%s5362_s28 + $0x18] sm:$0xff]   ;;  %v3024_v40 = vshll.u32 %v5837_v24, 16 }
  0xd5   : > { %4667 = vmatprep.mubr.msk.bf16.mxu1 %vm492_vm2, %v977_v33  ;;  %v2947_v33 = vsel %vm2903_vm6, %v2937_v5, %v2946_v45  ;;  %3842 = vperm.xlu0 %5218, %v3716_v19   ;;  %v3718_v5 = vld [vmem:[%s6384_s2 + $0xc0] sm:$0xff]  ;;  %v2974_v45 = vsel %vm2903_vm6, %v2964_v41, %v2973_v51  ;;  %v2994_v19 = vshrl.u32 %v5808_v47, 16  ;;  %v1393_v25 = vrot.slane %v5284_v35, 1 }
  0xd6   : > { %3847 = vperm.xlu1 %5219, %v3717_v56   ;;  %v2999_v56 = vrot.slane %v2997_v58, 3  ;;  %v3023_v58 = vrot.slane %v3021_v9, 2  ;;  %v3033_v35 = vshll.u32 %v5859_v10, 16  ;;  %v3051_v9 = vshll.u32 %v5889_v17, 16 }
  0xd7   : > { %4834 = vmatmul.mubr.msk.bf16.vlgmr.msra.gmra.mrb[0].mxu0 %vm492_vm2, %v2929_v49  ;;  %v2979_v49 = vshll.u32 %v5790_v13, 16  ;;  %v2996_v41 = vrot.slane %v2994_v19, 2 }
  0xd8   : > { %4870 = vmatpush3.bf16.msra.mxu0 %v3443_v30  ;;  %4837 = vmatprep.mubr.msk.bf16.mxu0 %vm492_vm2, %v2938_v36  ;;  %v3719_v30 = vld [vmem:[%s6384_s2 + $0xc8] sm:$0xff]  ;;  %v3720_v36 = vld [vmem:[%s6384_s2 + $0xd0] sm:$0xff] }
  0xd9   : > { %3852 = vperm.xlu0 %5218, %v3718_v5   ;;  %v2981_v32 = vrot.slane %v2979_v49, 3  ;;  %v5285_v5 = vld [vmem:[%s5362_s28 + $0x20] sm:$0xff]   ;;  %v3005_v49 = vrot.slane %v3003_v11, 2  ;;  %v3026_v11 = vrot.slane %v3024_v40, 3 }
  0xda   : > { %3857 = vperm.xlu1 %5219, %v3719_v30   ;;  %v3726_v30 = vld [vmem:[%s6384_s2 + $0x100] sm:$0xff] }
  0xdc   : > { %4668 = vmatmul.mubr.msk.bf16.gmra.mrb[24].mxu1 %vm492_vm2, %v979_v43  ;;  %v2978_v43 = vrot.slane %v2976_v48, 2 }
  0xdd   : > { %4671 = vmatprep.mubr.msk.bf16.mxu1 %vm492_vm2, %v981_v23  ;;  %v2987_v23 = vrot.slane %v2985_v54, 2  ;;  %3862 = vperm.xlu0 %5218, %v3720_v36   ;;  %v3000_v36 = vor.u32 %v2999_v56, %v2996_v41  ;;  %v3042_v41 = vshll.u32 %v5864_v44, 16  ;;  %v5288_v56 = vld [vmem:[%s5362_s28 + $0x38] sm:$0xff]  }
  0xde   : > { %v2982_v0 = vor.u32 %v2981_v32, %v2978_v43  ;;  %3867 = vperm.xlu1 %5219, %v3721_v37   ;;  %v3015_v43 = vshll.u32 %v5828_v16, 16 }
  0xdf   : > { %4838 = vmatmul.mubr.msk.bf16.gmra.mrb[4].mxu0 %vm492_vm2, %v2947_v33  ;;  %v2991_v6 = vor.u32 %v2990_v62, %v2987_v23  ;;  %v3006_v33 = vshll.u32 %v5813_v52, 16  ;;  %v5286_v23 = vld [vmem:[%s5362_s28 + $0x28] sm:$0xff]  }
  0xe0   : > { %4841 = vmatprep.mubr.msk.bf16.mxu0 %vm492_vm2, %v2956_v34  ;;  %v3724_v34 = vld [vmem:[%s6384_s2 + $0xf0] sm:$0xff]  ;;  %v1397_v62 = vrot.slane %v5286_v23, 1  ;;  %v5290_v23 = vld [vmem:[%s5362_s28 + $0x48] sm:$0xff]  }
  0xe1   : > { %3872 = vperm.xlu0 %5218, %v3722_v27   ;;  %v2992_v48 = vsel %vm2903_vm6, %v2982_v0, %v2991_v6  ;;  %v3008_v54 = vrot.slane %v3006_v33, 3  ;;  %v3001_v37 = vsel %vm2903_vm6, %v2991_v6, %v3000_v36  ;;  %v3014_v27 = vrot.slane %v3012_v18, 2  ;;  %v3729_v33 = vld [vmem:[%s6384_s2 + $0x118] sm:$0xff] }
  0xe2   : > { %3877 = vperm.xlu1 %5219, %v3723_v61  }
  0xe3   : > { %v3009_v32 = vor.u32 %v3008_v54, %v3005_v49  ;;  %v3035_v49 = vrot.slane %v3033_v35, 3  ;;  %v5289_v54 = vld [vmem:[%s5362_s28 + $0x40] sm:$0xff]  }
  0xe4   : > { %4672 = vmatmul.mubr.msk.bf16.gmra.mrb[28].mxu1 %vm492_vm2, %v983_v39  ;;  %v2983_v39 = vsel %vm2903_vm6, %v2973_v51, %v2982_v0  ;;  %v1394_v51 = vsel %vm950_vm5, %v1391_v29, %v1393_v25  ;;  %v3727_v29 = vld [vmem:[%s6384_s2 + $0x108] sm:$0xff]  ;;  %v5287_v0 = vld [vmem:[%s5362_s28 + $0x30] sm:$0xff]  }
  0xe5   : > { %4675 = vmatprep.mubr.msk.bf16.mxu1 %vm492_vm2, %v985_v4  ;;  %v1395_v4 = vrot.slane %v5285_v5, 1  ;;  %3882 = vperm.xlu0 %5218, %v3724_v34   ;;  %v3010_v19 = vsel %vm2903_vm6, %v3000_v36, %v3009_v32  ;;  %v3030_v34 = vshrl.u32 %v5859_v10, 16  ;;  %v1401_v5 = vrot.slane %v5288_v56, 1 }
  0xe6   : > { %3887 = vperm.xlu1 %5219, %v3725_v63   ;;  %v1403_v63 = vrot.slane %v5289_v54, 1  ;;  %v3044_v36 = vrot.slane %v3042_v41, 3  ;;  %v5292_v41 = vld [vmem:[%s5362_s28 + $0x58] sm:$0xff]  }
  0xe7   : > { %4842 = vmatmul.mubr.msk.bf16.gmra.mrb[8].mxu0 %vm492_vm2, %v2965_v42  ;;  %v1396_v42 = vsel %vm950_vm5, %v1393_v25, %v1395_v4  ;;  %v3027_v25 = vor.u32 %v3026_v11, %v3023_v58  ;;  %v1409_v56 = vrot.slane %v5292_v41, 1  ;;  %v1812_v41 = vshrl.u32 %v5657_v57, 16 }
  0xe8   : > { %4845 = vmatprep.mubr.msk.bf16.mxu0 %vm492_vm2, %v2974_v45  ;;  %v3728_v45 = vld [vmem:[%s6384_s2 + $0x110] sm:$0xff] }
  0xe9   : > { %3892 = vperm.xlu0 %5218, %v3726_v30  }
  0xea   : > { %3897 = vperm.xlu1 %5219, %v3727_v29   ;;  %v3057_v29 = vshrl.u32 %v5893_v21, 16 }
  0xec   : > { %4676 = vmatmul.mubr.msk.bf16.gmra.mrb[32].mxu1 %vm492_vm2, %v987_v20  ;;  %v3017_v20 = vrot.slane %v3015_v43, 3  ;;  %v1404_v43 = vsel %vm950_vm5, %v1401_v5, %v1403_v63  ;;  %v3059_v11 = vrot.slane %v3057_v29, 2 }
  0xed   : > { %4681 = vmatprep.mubr.msk.bf16.mxu1 %vm492_vm2, %v1392_v14  ;;  %v1399_v14 = vrot.slane %v5287_v0, 1  ;;  %3902 = vperm.xlu0 %5218, %v3728_v45   ;;  %v3060_v45 = vshll.u32 %v5893_v21, 16  ;;  %v5291_v0 = vld [vmem:[%s5362_s28 + $0x50] sm:$0xff]  }
  0xee   : > { %v3018_v6 = vor.u32 %v3017_v20, %v3014_v27  ;;  %3907 = vperm.xlu1 %5219, %v3729_v33   ;;  %v3053_v20 = vrot.slane %v3051_v9, 3 }
  0xef   : > { %4846 = vmatmul.mubr.msk.bf16.gmra.mrb[12].mxu0 %vm492_vm2, %v2983_v39  ;;  %v1400_v61 = vsel %vm950_vm5, %v1397_v62, %v1399_v14  ;;  %v3039_v39 = vshrl.u32 %v5864_v44, 16  ;;  %v3062_v33 = vrot.slane %v3060_v45, 3  ;;  %v3356_v45 = vrot.slane %v5735_v50, 3 }
  0xf0   : > { %4849 = vmatprep.mubr.msk.bf16.mxu0 %vm492_vm2, %v2992_v48  ;;  %v3032_v48 = vrot.slane %v3030_v34, 2  ;;  %v3028_v30 = vsel %vm2903_vm6, %v3018_v6, %v3027_v25  ;;  %v3358_v50 = vrot.slane %v5747_v53, 3 }
  0xf2   : > { %v3036_v18 = vor.u32 %v3035_v49, %v3032_v48  ;;  %v1411_v49 = vrot.slane %v5638_v55, 1 }
  0xf4   : > { %4682 = vmatmul.mubr.msk.bf16.vlgmr.msra.gmra.mrb[0].mxu1 %vm492_vm2, %v1394_v51  ;;  %v3041_v51 = vrot.slane %v3039_v39, 2  ;;  %v3344_v39 = vld [vmem:[%s5362_s28 + $0x10] sm:$0x8] }
  0xf5   : > { %4685 = vmatprep.mubr.msk.bf16.mxu1 %vm492_vm2, %v1396_v42  ;;  %4908 = vmatpush3.bf16.msra.mxu1 %v5344_v2  ;;  %v1398_v2 = vsel %vm950_vm5, %v1395_v4, %v1397_v62  ;;  %v3019_v4 = vsel %vm2903_vm6, %v3009_v32, %v3018_v6  ;;  %v1402_v42 = vsel %vm950_vm5, %v1399_v14, %v1401_v5  ;;  %v3048_v32 = vshrl.u32 %v5889_v17, 16 }
  0xf6   : > { %v3045_v40 = vor.u32 %v3044_v36, %v3041_v51  ;;  %v1405_v62 = vrot.slane %v5290_v23, 1  ;;  %v1407_v14 = vrot.slane %v5291_v0, 1  ;;  %v1412_v36 = vsel %vm950_vm5, %v1409_v56, %v1411_v49 }
  0xf7   : > { %4850 = vmatmul.mubr.msk.bf16.gmra.mrb[16].mxu0 %vm492_vm2, %v3001_v37  ;;  %v3037_v37 = vsel %vm2903_vm6, %v3027_v25, %v3036_v18  ;;  %v3050_v27 = vrot.slane %v3048_v32, 2  ;;  %v3063_v25 = vor.u32 %v3062_v33, %v3059_v11  ;;  %v1415_v32 = vrot.slane %v5663_v60, 1 }
  0xf8   : > { %4853 = vmatprep.mubr.msk.bf16.mxu0 %vm492_vm2, %v3010_v19  ;;  %v6116_v19 = vld [vmem:[%s5362_s28 + $0xa0] ss:$0 sps:$4 sm:$0x77]   ;;  %v3046_v58 = vsel %vm2903_vm6, %v3036_v18, %v3045_v40  ;;  %v3352_v18 = vrot.slane %v5718_v38, 3  ;;  %v3354_v38 = vrot.slane %v5731_v46, 3  ;;  %v1417_v23 = vrot.slane %v5675_v7, 1 }
  0xf9   : > { %v3054_v6 = vor.u32 %v3053_v20, %v3050_v27  ;;  %v3066_v34 = vshrl.u32 %v6116_v19, 16  ;;  %v3069_v35 = vshll.u32 %v6116_v19, 16  ;;  %v3360_v0 = vrot.slane %v5753_v28, 3 }
  0xfa   : > { %v3357_v27 = vsel %vm3350_vm7, %v3354_v38, %v3356_v45  ;;  %v1418_v46 = vsel %vm950_vm5, %v1415_v32, %v1417_v23  ;;  %v1423_v11 = vrot.slane %v5695_v26, 1  ;;  %v1803_v33 = vshrl.u32 %v5638_v55, 16 }
  0xfb   : > { %v3055_v5 = vsel %vm2903_vm6, %v3045_v40, %v3054_v6  ;;  %v3071_v48 = vrot.slane %v3069_v35, 3  ;;  %v3064_v54 = vsel %vm2903_vm6, %v3054_v6, %v3063_v25  ;;  %v3361_v53 = vsel %vm3350_vm7, %v3358_v50, %v3360_v0  ;;  %v5281_v6 = vld [vmem:[%s5362_s28 + $0x98] ss:$0 sps:$4 sm:$0x11]   ;;  %s5208_s28 = smul.u32 288, %s6388_s16 }
  0xfc   : > { %4686 = vmatmul.mubr.msk.bf16.gmra.mrb[4].mxu1 %vm492_vm2, %v1398_v2  ;;  %v1406_v2 = vsel %vm950_vm5, %v1403_v63, %v1405_v62  ;;  %v4373_v63 = vcombine.low %v3344_v39, %v5705_v31  ;;  %v1805_v35 = vrot.slane %v1803_v33, 1  ;;  %v3364_v39 = vrot.slane %v5776_v1, 3 }
  0xfd   : > { %4689 = vmatprep.mubr.msk.bf16.mxu1 %vm492_vm2, %v1400_v61  ;;  %v1408_v61 = vsel %vm950_vm5, %v1405_v62, %v1407_v14  ;;  %v3355_v62 = vsel %vm3350_vm7, %v3352_v18, %v3354_v38  ;;  %s6289_s22 = scalar_lea.vmem %s6385_s3, %s5208_s28 }
  0xff   : > { %4854 = vmatmul.mubr.msk.bf16.gmra.mrb[20].mxu0 %vm492_vm2, %v3019_v4  ;;  %v3068_v4 = vrot.slane %v3066_v34, 2 }
 0x100   : > { %4857 = vmatprep.mubr.msk.bf16.mxu0 %vm492_vm2, %v3028_v30  ;;  %v1410_v30 = vsel %vm950_vm5, %v1407_v14, %v1409_v56  ;;  %v1421_v14 = vrot.slane %v5691_v22, 1  ;;  %v1815_v56 = vshll.u32 %v5657_v57, 16 }
 0x101   : > { %v3072_v51 = vor.u32 %v3071_v48, %v3068_v4  ;;  %v1824_v48 = vshll.u32 %v5663_v60, 16 }
 0x102   : > { %v1424_v34 = vsel %vm950_vm5, %v1421_v14, %v1423_v11 }
 0x103   : > { %v3073_v31 = vsel %vm2903_vm6, %v3063_v25, %v3072_v51 }
 0x104   : > { %4690 = vmatmul.mubr.msk.bf16.gmra.mrb[8].mxu1 %vm492_vm2, %v1402_v42  ;;  %v3351_v42 = vrot.slane %v4373_v63, 3  ;;  %v1817_v63 = vrot.slane %v1815_v56, 2 }
 0x105   : > { %4693 = vmatprep.mubr.msk.bf16.mxu1 %vm492_vm2, %v1404_v43  ;;  %v1413_v43 = vrot.slane %v5657_v57, 1 }
 0x106   : > { %v3353_v9 = vsel %vm3350_vm7, %v3351_v42, %v3352_v18  ;;  %v3368_v42 = vrot.slane %v5795_v8, 3  ;;  %v1830_v18 = vshrl.u32 %v5675_v7, 16 }
 0x107   : > { %4858 = vmatmul.mubr.msk.bf16.gmra.mrb[24].mxu0 %vm492_vm2, %v3037_v37  ;;  %v1414_v40 = vsel %vm950_vm5, %v1411_v49, %v1413_v43  ;;  %v1416_v29 = vsel %vm950_vm5, %v1413_v43, %v1415_v32  ;;  %v1419_v37 = vrot.slane %v5679_v12, 1  ;;  %v1833_v43 = vshll.u32 %v5675_v7, 16 }
 0x108   : > { %4861 = vmatprep.mubr.msk.bf16.mxu0 %vm492_vm2, %v3046_v58  ;;  %v3359_v58 = vsel %vm3350_vm7, %v3356_v45, %v3358_v50 }
 0x109   : > { %v1420_v20 = vsel %vm950_vm5, %v1417_v23, %v1419_v37  ;;  %v1422_v28 = vsel %vm950_vm5, %v1419_v37, %v1421_v14  ;;  %v1835_v38 = vrot.slane %v1833_v43, 2  ;;  %v1848_v37 = vshrl.u32 %v5691_v22, 16 }
 0x10b   : > { %v1850_v14 = vrot.slane %v1848_v37, 1 }
 0x10c   : > { %4694 = vmatmul.mubr.msk.bf16.gmra.mrb[12].mxu1 %vm492_vm2, %v1406_v2  ;;  %v1806_v2 = vshll.u32 %v5638_v55, 16  ;;  %v1425_v55 = vrot.slane %v5281_v6, 1  ;;  %v1869_v6 = vshll.u32 %v5711_v59, 16 }
 0x10d   : > { %4697 = vmatprep.mubr.msk.bf16.mxu1 %vm492_vm2, %v1408_v61  ;;  %v3362_v61 = vrot.slane %v5772_v3, 3  ;;  %v1821_v3 = vshrl.u32 %v5663_v60, 16 }
 0x10e   : > { %v1808_v25 = vrot.slane %v1806_v2, 2  ;;  %v1426_v1 = vsel %vm950_vm5, %v1423_v11, %v1425_v55  ;;  %v3374_v11 = vrot.slane %v5828_v16, 3 }
 0x10f   : > { %4862 = vmatmul.mubr.msk.bf16.gmra.mrb[28].mxu0 %vm492_vm2, %v3055_v5  ;;  %v3363_v5 = vsel %vm3350_vm7, %v3360_v0, %v3362_v61  ;;  %v3365_v49 = vsel %vm3350_vm7, %v3362_v61, %v3364_v39  ;;  %v1823_v51 = vrot.slane %v1821_v3, 1  ;;  %v3384_v3 = vrot.slane %v5893_v21, 3 }
 0x110   : > { %4865 = vmatprep.mubr.msk.bf16.mxu0 %vm492_vm2, %v3064_v54  ;;  %v1809_v4 = vor.u32 %v1808_v25, %v1805_v35  ;;  %v1814_v54 = vrot.slane %v1812_v41, 1  ;;  %v3380_v41 = vrot.slane %v5864_v44, 3 }
 0x112   : > { %v1810_v57 = vsel %vm1703_vm3, %v5552_v15, %v1809_v4  ;;  %v1818_v60 = vor.u32 %v1817_v63, %v1814_v54  ;;  %v1842_v15 = vshll.u32 %v5679_v12, 16 }
 0x114   : > { %4698 = vmatmul.mubr.msk.bf16.gmra.mrb[16].mxu1 %vm492_vm2, %v1410_v30  ;;  %v3366_v30 = vrot.slane %v5790_v13, 3  ;;  %v1839_v13 = vshrl.u32 %v5679_v12, 16  ;;  %v1819_v8 = vsel %vm1703_vm3, %v1809_v4, %v1818_v60  ;;  %v1844_v23 = vrot.slane %v1842_v15, 2 }
 0x115   : > { %4701 = vmatprep.mubr.msk.bf16.mxu1 %vm492_vm2, %v1412_v36  ;;  %v1826_v36 = vrot.slane %v1824_v48, 2 }
 0x116   : > { %v1841_v45 = vrot.slane %v1839_v13, 1 }
 0x117   : > { %4866 = vmatmul.mubr.msk.bf16.gmra.mrb[32].mxu0 %vm492_vm2, %v3073_v31  ;;  %v3367_v31 = vsel %vm3350_vm7, %v3364_v39, %v3366_v30  ;;  %v1827_v32 = vor.u32 %v1826_v36, %v1823_v51  ;;  %v3378_v39 = vrot.slane %v5859_v10, 3  ;;  %v3382_v10 = vrot.slane %v5889_v17, 3 }
 0x118   : > { %4871 = vmatprep.mubr.msk.bf16.mxu0 %vm492_vm2, %v3353_v9  ;;  %v3369_v9 = vsel %vm3350_vm7, %v3366_v30, %v3368_v42  ;;  %v1845_v50 = vor.u32 %v1844_v23, %v1841_v45 }
 0x119   : > { %v1828_v7 = vsel %vm1703_vm3, %v1818_v60, %v1827_v32  ;;  %v3383_v44 = vsel %vm3350_vm7, %v3380_v41, %v3382_v10  ;;  %v3385_v48 = vsel %vm3350_vm7, %v3382_v10, %v3384_v3  ;;  %v3743_v60 = vpop.permute.xlu1 %3742 }
 0x11c   : > { %4702 = vmatmul.mubr.msk.bf16.gmra.mrb[20].mxu1 %vm492_vm2, %v1414_v40  ;;  %v1832_v40 = vrot.slane %v1830_v18, 1 }
 0x11d   : > { %4705 = vmatprep.mubr.msk.bf16.mxu1 %vm492_vm2, %v1416_v29  ;;  %v3370_v29 = vrot.slane %v5808_v47, 3  ;;  %v1857_v47 = vshrl.u32 %v5695_v26, 16 }
 0x11e   : > { %v1836_v12 = vor.u32 %v1835_v38, %v1832_v40 }
 0x11f   : > { %4872 = vmatmul.mubr.msk.bf16.vlgmr.msra.gmra.mrb[0].mxu0 %vm492_vm2, %v3355_v62  ;;  %v3372_v62 = vrot.slane %v5813_v52, 3  ;;  %v1859_v33 = vrot.slane %v1857_v47, 1  ;;  %v3733_v36 = vpop.permute.xlu0 %3732 }
 0x120   : > { %4875 = vmatprep.mubr.msk.bf16.mxu0 %vm492_vm2, %v3357_v27  ;;  %v1851_v27 = vshll.u32 %v5691_v22, 16  ;;  %v1837_v52 = vsel %vm1703_vm3, %v1827_v32, %v1836_v12  ;;  %v1846_v22 = vsel %vm1703_vm3, %v1836_v12, %v1845_v50 }
 0x121   : > { %v3373_v0 = vsel %vm3350_vm7, %v3370_v29, %v3372_v62  ;;  %v3375_v61 = vsel %vm3350_vm7, %v3372_v62, %v3374_v11 }
 0x123   : > { %v3738_v43 = vpop.permute.xlu0 %3737 }
 0x124   : > { %4706 = vmatmul.mubr.msk.bf16.gmra.mrb[24].mxu1 %vm492_vm2, %v1418_v46  ;;  %v3371_v46 = vsel %vm3350_vm7, %v3368_v42, %v3370_v29 }
 0x125   : > { %4709 = vmatprep.mubr.msk.bf16.mxu1 %vm492_vm2, %v1420_v20  ;;  %v1860_v20 = vshll.u32 %v5695_v26, 16  ;;  %v3748_v32 = vpop.permute.xlu1 %3747 }
 0x127   : > { %4876 = vmatmul.mubr.msk.bf16.gmra.mrb[4].mxu0 %vm492_vm2, %v3359_v58  ;;  %v1853_v58 = vrot.slane %v1851_v27, 2  ;;  %v1862_v2 = vrot.slane %v1860_v20, 2  ;;  %v3753_v15 = vpop.permute.xlu0 %3752 }
 0x128   : > { %4879 = vmatprep.mubr.msk.bf16.mxu0 %vm492_vm2, %v3361_v53  ;;  %v3376_v53 = vrot.slane %v5837_v24, 3  ;;  %v1871_v24 = vrot.slane %v1869_v6, 2 }
 0x129   : > { %v1854_v26 = vor.u32 %v1853_v58, %v1850_v14 }
 0x12a   : > { %v3377_v16 = vsel %vm3350_vm7, %v3374_v11, %v3376_v53  ;;  %v3379_v56 = vsel %vm3350_vm7, %v3376_v53, %v3378_v39 }
 0x12b   : > { %v1855_v35 = vsel %vm1703_vm3, %v1845_v50, %v1854_v26 }
 0x12c   : > { %4710 = vmatmul.mubr.msk.bf16.gmra.mrb[28].mxu1 %vm492_vm2, %v1422_v28  ;;  %v1866_v28 = vshrl.u32 %v5711_v59, 16 }
 0x12d   : > { %4713 = vmatprep.mubr.msk.bf16.mxu1 %vm492_vm2, %v1424_v34  ;;  %v1863_v34 = vor.u32 %v1862_v2, %v1859_v33 }
 0x12e   : > { %v1868_v25 = vrot.slane %v1866_v28, 1 }
 0x12f   : > { %4880 = vmatmul.mubr.msk.bf16.gmra.mrb[8].mxu0 %vm492_vm2, %v3363_v5  ;;  %v1864_v55 = vsel %vm1703_vm3, %v1854_v26, %v1863_v34  ;;  %v3381_v5 = vsel %vm3350_vm7, %v3378_v39, %v3380_v41 }
 0x130   : > { %4883 = vmatprep.mubr.msk.bf16.mxu0 %vm492_vm2, %v3365_v49  ;;  %v1872_v59 = vor.u32 %v1871_v24, %v1868_v25  ;;  %v3386_v49 = vrot.slane %v6116_v19, 3 }
 0x132   : > { %v1873_v4 = vsel %vm1703_vm3, %v1863_v34, %v1872_v59 }
 0x134   : > { %4714 = vmatmul.mubr.msk.bf16.gmra.mrb[32].mxu1 %vm492_vm2, %v1426_v1  ;;  %v3387_v1 = vsel %vm3350_vm7, %v3384_v3, %v3386_v49 }
 0x135   : > { %4739 = vmatprep.mubr.msk.bf16.mxu1 %vm492_vm2, %v1810_v57 }
 0x137   : > { %4884 = vmatmul.mubr.msk.bf16.gmra.mrb[12].mxu0 %vm492_vm2, %v3367_v31 }
 0x138   : > { %4887 = vmatprep.mubr.msk.bf16.mxu0 %vm492_vm2, %v3369_v9 }
 0x13c   : > { %4740 = vmatmul.mubr.msk.bf16.vlgmr.msra.gmra.mrb[20].mxu1 %vm492_vm2, %v1819_v8  ;;  %v6261_v8 = vpop.permute.xlu1 %3757 }
 0x13d   : > { %4743 = vmatprep.mubr.msk.bf16.mxu1 %vm492_vm2, %v1828_v7  ;;  %v3763_v7 = vpop.permute.xlu0 %3762 }
 0x13f   : > { %4888 = vmatmul.mubr.msk.bf16.gmra.mrb[16].mxu0 %vm492_vm2, %v3371_v46 }
 0x140   : > { %4891 = vmatprep.mubr.msk.bf16.mxu0 %vm492_vm2, %v3373_v0  ;;  %v3768_v45 = vpop.permute.xlu1 %3767 }
 0x141   : > { %v6275_v37 = vpop.permute.xlu0 %3772 }
 0x144   : > { %4744 = vmatmul.mubr.msk.bf16.gmra.mrb[24].mxu1 %vm492_vm2, %v1837_v52  ;;  %v6279_v46 = vpop.permute.xlu1 %3777 }
 0x145   : > { %4747 = vmatprep.mubr.msk.bf16.mxu1 %vm492_vm2, %v1846_v22  ;;  %v6281_v50 = vpop.permute.xlu0 %3782 }
 0x147   : > { %4892 = vmatmul.mubr.msk.bf16.gmra.mrb[20].mxu0 %vm492_vm2, %v3375_v61 }
 0x148   : > { %4895 = vmatprep.mubr.msk.bf16.mxu0 %vm492_vm2, %v3377_v16  ;;  %v6284_v47 = vpop.permute.xlu1 %3787 }
 0x149   : > { %v6291_v14 = vpop.permute.xlu0 %3792 }
 0x14c   : > { %4748 = vmatmul.mubr.msk.bf16.gmra.mrb[28].mxu1 %vm492_vm2, %v1855_v35  ;;  %v6294_v2 = vpop.permute.xlu1 %3797 }
 0x14d   : > { %4751 = vmatprep.mubr.msk.bf16.mxu1 %vm492_vm2, %v1864_v55  ;;  %v6299_v34 = vpop.permute.xlu0 %3802 }
 0x14f   : > { %4896 = vmatmul.mubr.msk.bf16.gmra.mrb[24].mxu0 %vm492_vm2, %v3379_v56 }
 0x150   : > { %4899 = vmatprep.mubr.msk.bf16.mxu0 %vm492_vm2, %v3381_v5  ;;  %v6301_v41 = vpop.permute.xlu1 %3807 }
 0x154   : > { %4752 = vmatmul.mubr.msk.bf16.gmra.mrb[32].mxu1 %vm492_vm2, %v1873_v4 }
 0x157   : > { %4900 = vmatmul.mubr.msk.bf16.gmra.mrb[28].mxu0 %vm492_vm2, %v3383_v44 }
 0x158   : > { %4903 = vmatprep.mubr.msk.bf16.mxu0 %vm492_vm2, %v3385_v48 }
 0x15f   : > { %4904 = vmatmul.mubr.msk.bf16.gmra.mrb[32].mxu0 %vm492_vm2, %v3387_v1 }
 0x1c7   : > { %v4683_v54 = vpop.f32.mrb[0].mxu1 }
 0x1c8   : > { %v1518_v17 = vpop.f32.mrb[1].mxu1 }
 0x1c9   : > { %v4684_v63 = vpop.f32.mrb[2].mxu1 }
 0x1ca   : > { %v1521_v21 = vpop.f32.mrb[3].mxu1 }
 0x1cf   : > { %v4687_v30 = vpop.f32.mrb[4].mxu1 }
 0x1d0   : > { %v1534_v57 = vpop.f32.mrb[5].mxu1 }
 0x1d1   : > { %v4688_v51 = vpop.f32.mrb[6].mxu1 }
 0x1d2   : > { %v6249_v42 = vpop.f32.mrb[7].mxu1 }
 0x1d7   : > { %v6251_v18 = vpop.f32.mrb[8].mxu1 }
 0x1d8   : > { %v6253_v31 = vpop.f32.mrb[9].mxu1 }
 0x1d9   : > { %v6255_v19 = vpop.f32.mrb[10].mxu1 }
 0x1da   : > { %v6257_v13 = vpop.f32.mrb[11].mxu1 }
 0x1df   : > { %v6259_v9 = vpop.f32.mrb[12].mxu1 }
 0x1e0   : > { %v6263_v40 = vpop.f32.mrb[13].mxu1 }
 0x1e1   : > { %v6265_v38 = vpop.f32.mrb[14].mxu1 }
 0x1e2   : > { %v6267_v29 = vpop.f32.mrb[15].mxu1 }
 0x1e7   : > { %v6269_v23 = vpop.f32.mrb[16].mxu1 }
 0x1e8   : > { %v6271_v62 = vpop.f32.mrb[17].mxu1 }
 0x1e9   : > { %v6273_v12 = vpop.f32.mrb[18].mxu1 }
 0x1ea   : > { %v6277_v27 = vpop.f32.mrb[19].mxu1 }
 0x1f2   : > { %v4873_v20 = vpop.f32.mrb[0].mxu0 }
 0x1f3   : > { %v4909_v0 = vadd.f32 %v4873_v20, %v4683_v54  ;;  %v3479_v52 = vpop.f32.mrb[1].mxu0 }
 0x1f4   : > { %v4910_v58 = vadd.f32 %v3479_v52, %v1518_v17  ;;  %v4874_v11 = vpop.f32.mrb[2].mxu0 }
 0x1f5   : > { %3660 = vst [vmem:[%s6289_s22 + $0x10] sm:$0xff] %v4909_v0  ;;  %v4911_v22 = vadd.f32 %v4874_v11, %v4684_v63  ;;  %v3482_v33 = vpop.f32.mrb[3].mxu0  ;;  %v3912_v28 = vmul.f32 %v4909_v0, %v3743_v60 }
 0x1f6   : > { %3658 = vst [vmem:[%s6289_s22] sm:$0xff] %v4910_v58  ;;  %v3910_v53 = vmul.f32 %v4910_v58, %v3733_v36  ;;  %v4912_v26 = vadd.f32 %v3482_v33, %v1521_v21  ;;  %v6307_v21 = vpop.permute.xlu0 %3812 }
 0x1f7   : > { %3661 = vst [vmem:[%s6289_s22 + $0x18] sm:$0xff] %v4911_v22  ;;  %v3913_v61 = vmul.f32 %v4911_v22, %v3748_v32  ;;  %v3990_v59 = vmul.f32 %v3912_v28, %v3912_v28 }
 0x1f8   : > { %3659 = vst [vmem:[%s6289_s22 + $0x8] sm:$0xff] %v4912_v26  ;;  %v3911_v6 = vmul.f32 %v4912_v26, %v3738_v43  ;;  %v3988_v16 = vmul.f32 %v3910_v53, %v3910_v53 }
 0x1f9   : > { %v3991_v3 = vmul.f32 %v3913_v61, %v3913_v61 }
 0x1fa   : > { %v3946_v35 = vadd.f32 %v3911_v6, %v3910_v53  ;;  %v3989_v25 = vmul.f32 %v3911_v6, %v3911_v6  ;;  %v4877_v24 = vpop.f32.mrb[4].mxu0  ;;  %v6317_v26 = vpop.permute.xlu0 %3822 }
 0x1fb   : > { %v4913_v39 = vadd.f32 %v4877_v24, %v4687_v30  ;;  %v3495_v55 = vpop.f32.mrb[5].mxu0 }
 0x1fc   : > { %v3947_v56 = vadd.f32 %v3946_v35, %v3912_v28  ;;  %v4024_v5 = vadd.f32 %v3989_v25, %v3988_v16  ;;  %v4914_v4 = vadd.f32 %v3495_v55, %v1534_v57  ;;  %v4878_v10 = vpop.f32.mrb[6].mxu0 }
 0x1fd   : > { %3664 = vst [vmem:[%s6289_s22 + $0x30] sm:$0xff] %v4913_v39  ;;  %v4915_v44 = vadd.f32 %v4878_v10, %v4688_v51  ;;  %v3498_v48 = vpop.f32.mrb[7].mxu0  ;;  %v3916_v63 = vmul.f32 %v4913_v39, %v3763_v7  ;;  %v6311_v51 = vpop.permute.xlu1 %3817 }
 0x1fe   : > { %v4025_v49 = vadd.f32 %v4024_v5, %v3990_v59  ;;  %3662 = vst [vmem:[%s6289_s22 + $0x20] sm:$0xff] %v4914_v4  ;;  %v3914_v1 = vmul.f32 %v4914_v4, %v3753_v15  ;;  %v3948_v54 = vadd.f32 %v3947_v56, %v3913_v61  ;;  %v4916_v17 = vadd.f32 %v3498_v48, %v6249_v42  ;;  %v6330_v5 = vpop.permute.xlu0 %3832 }
 0x1ff   : > { %3665 = vst [vmem:[%s6289_s22 + $0x38] sm:$0xff] %v4915_v44  ;;  %v3917_v43 = vmul.f32 %v4915_v44, %v3768_v45  ;;  %v3994_v52 = vmul.f32 %v3916_v63, %v3916_v63 }
 0x200   : > { %v3949_v30 = vadd.f32 %v3948_v54, %v3914_v1  ;;  %v3992_v36 = vmul.f32 %v3914_v1, %v3914_v1  ;;  %v4026_v60 = vadd.f32 %v4025_v49, %v3991_v3  ;;  %3663 = vst [vmem:[%s6289_s22 + $0x28] sm:$0xff] %v4916_v17  ;;  %v3915_v57 = vmul.f32 %v4916_v17, %v6261_v8 }
 0x201   : > { %v3995_v53 = vmul.f32 %v3917_v43, %v3917_v43 }
 0x202   : > { %v4027_v32 = vadd.f32 %v4026_v60, %v3992_v36  ;;  %v3950_v20 = vadd.f32 %v3949_v30, %v3915_v57  ;;  %v3993_v15 = vmul.f32 %v3915_v57, %v3915_v57  ;;  %v4881_v0 = vpop.f32.mrb[8].mxu0 }
 0x203   : > { %v4917_v42 = vadd.f32 %v4881_v0, %v6251_v18  ;;  %v3511_v7 = vpop.f32.mrb[9].mxu0  ;;  %v3843_v0 = vpop.permute.xlu0 %3842 }
 0x204   : > { %v3951_v58 = vadd.f32 %v3950_v20, %v3916_v63  ;;  %v4028_v11 = vadd.f32 %v4027_v32, %v3993_v15  ;;  %v4918_v22 = vadd.f32 %v3511_v7, %v6253_v31  ;;  %v4882_v33 = vpop.f32.mrb[10].mxu0  ;;  %v6324_v31 = vpop.permute.xlu1 %3827 }
 0x205   : > { %3668 = vst [vmem:[%s6289_s22 + $0x50] sm:$0xff] %v4917_v42  ;;  %v4919_v8 = vadd.f32 %v4882_v33, %v6255_v19  ;;  %v3514_v45 = vpop.f32.mrb[11].mxu0  ;;  %v3920_v16 = vmul.f32 %v4917_v42, %v6281_v50 }
 0x206   : > { %v4029_v28 = vadd.f32 %v4028_v11, %v3994_v52  ;;  %3666 = vst [vmem:[%s6289_s22 + $0x40] sm:$0xff] %v4918_v22  ;;  %v3918_v18 = vmul.f32 %v4918_v22, %v6275_v37  ;;  %v3952_v6 = vadd.f32 %v3951_v58, %v3917_v43  ;;  %v4920_v61 = vadd.f32 %v3514_v45, %v6257_v13 }
 0x207   : > { %3669 = vst [vmem:[%s6289_s22 + $0x58] sm:$0xff] %v4919_v8  ;;  %v3921_v39 = vmul.f32 %v4919_v8, %v6284_v47  ;;  %v3998_v4 = vmul.f32 %v3920_v16, %v3920_v16 }
 0x208   : > { %v3953_v35 = vadd.f32 %v3952_v6, %v3918_v18  ;;  %v3996_v25 = vmul.f32 %v3918_v18, %v3918_v18  ;;  %v4030_v24 = vadd.f32 %v4029_v28, %v3995_v53  ;;  %3667 = vst [vmem:[%s6289_s22 + $0x48] sm:$0xff] %v4920_v61  ;;  %v3919_v19 = vmul.f32 %v4920_v61, %v6279_v46  ;;  %v6335_v54 = vpop.permute.xlu1 %3837 }
 0x209   : > { %v3999_v46 = vmul.f32 %v3921_v39, %v3921_v39 }
 0x20a   : > { %v4031_v55 = vadd.f32 %v4030_v24, %v3996_v25  ;;  %v3954_v59 = vadd.f32 %v3953_v35, %v3919_v19  ;;  %v3997_v37 = vmul.f32 %v3919_v19, %v3919_v19  ;;  %v4885_v56 = vpop.f32.mrb[12].mxu0  ;;  %v3853_v25 = vpop.permute.xlu0 %3852 }
 0x20b   : > { %v4921_v13 = vadd.f32 %v4885_v56, %v6259_v9  ;;  %v3527_v50 = vpop.f32.mrb[13].mxu0 }
 0x20c   : > { %v3955_v10 = vadd.f32 %v3954_v59, %v3920_v16  ;;  %v4032_v3 = vadd.f32 %v4031_v55, %v3997_v37  ;;  %v4922_v44 = vadd.f32 %v3527_v50, %v6263_v40  ;;  %v4886_v48 = vpop.f32.mrb[14].mxu0  ;;  %v3848_v58 = vpop.permute.xlu1 %3847 }
 0x20d   : > { %3672 = vst [vmem:[%s6289_s22 + $0x70] sm:$0xff] %v4921_v13  ;;  %v4923_v47 = vadd.f32 %v4886_v48, %v6265_v38  ;;  %v3530_v49 = vpop.f32.mrb[15].mxu0  ;;  %v3924_v40 = vmul.f32 %v4921_v13, %v6299_v34 }
 0x20e   : > { %v4033_v9 = vadd.f32 %v4032_v3, %v3998_v4  ;;  %3670 = vst [vmem:[%s6289_s22 + $0x60] sm:$0xff] %v4922_v44  ;;  %v3922_v17 = vmul.f32 %v4922_v44, %v6291_v14  ;;  %v3956_v63 = vadd.f32 %v3955_v10, %v3921_v39  ;;  %v4924_v30 = vadd.f32 %v3530_v49, %v6267_v29  ;;  %v3863_v49 = vpop.permute.xlu0 %3862 }
 0x20f   : > { %v4741_v1 = vpop.f32.mrb[20].mxu1  ;;  %3673 = vst [vmem:[%s6289_s22 + $0x78] sm:$0xff] %v4923_v47  ;;  %v3925_v15 = vmul.f32 %v4923_v47, %v6301_v41  ;;  %v4002_v11 = vmul.f32 %v3924_v40, %v3924_v40 }
 0x210   : > { %v2045_v36 = vpop.f32.mrb[21].mxu1  ;;  %v3957_v57 = vadd.f32 %v3956_v63, %v3922_v17  ;;  %v4000_v43 = vmul.f32 %v3922_v17, %v3922_v17  ;;  %v4034_v38 = vadd.f32 %v4033_v9, %v3999_v46  ;;  %3671 = vst [vmem:[%s6289_s22 + $0x68] sm:$0xff] %v4924_v30  ;;  %v3923_v32 = vmul.f32 %v4924_v30, %v6294_v2  ;;  %v3858_v13 = vpop.permute.xlu1 %3857 }
 0x211   : > { %v4742_v60 = vpop.f32.mrb[22].mxu1  ;;  %v4003_v8 = vmul.f32 %v3925_v15, %v3925_v15 }
 0x212   : > { %v2048_v20 = vpop.f32.mrb[23].mxu1  ;;  %v4035_v14 = vadd.f32 %v4034_v38, %v4000_v43  ;;  %v3958_v42 = vadd.f32 %v3957_v57, %v3923_v32  ;;  %v4001_v7 = vmul.f32 %v3923_v32, %v3923_v32  ;;  %v4889_v29 = vpop.f32.mrb[16].mxu0 }
 0x213   : > { %v4925_v34 = vadd.f32 %v4889_v29, %v6269_v23  ;;  %v3543_v52 = vpop.f32.mrb[17].mxu0 }
 0x214   : > { %v3959_v22 = vadd.f32 %v3958_v42, %v3924_v40  ;;  %v4036_v33 = vadd.f32 %v4035_v14, %v4001_v7  ;;  %v4926_v2 = vadd.f32 %v3543_v52, %v6271_v62  ;;  %v4890_v53 = vpop.f32.mrb[18].mxu0 }
 0x215   : > { %3676 = vst [vmem:[%s6289_s22 + $0x90] sm:$0xff] %v4925_v34  ;;  %v4927_v41 = vadd.f32 %v4890_v53, %v6273_v12  ;;  %v3546_v45 = vpop.f32.mrb[19].mxu0  ;;  %v3928_v35 = vmul.f32 %v4925_v34, %v6317_v26 }
 0x216   : > { %v4037_v18 = vadd.f32 %v4036_v33, %v4002_v11  ;;  %3674 = vst [vmem:[%s6289_s22 + $0x80] sm:$0xff] %v4926_v2  ;;  %v3926_v23 = vmul.f32 %v4926_v2, %v6307_v21  ;;  %v3960_v6 = vadd.f32 %v3959_v22, %v3925_v15  ;;  %v4928_v61 = vadd.f32 %v3546_v45, %v6277_v27  ;;  %v3868_v15 = vpop.permute.xlu1 %3867 }
 0x217   : > { %v4745_v28 = vpop.f32.mrb[24].mxu1  ;;  %3677 = vst [vmem:[%s6289_s22 + $0x98] sm:$0xff] %v4927_v41  ;;  %v3929_v59 = vmul.f32 %v4927_v41, %v6324_v31  ;;  %v4006_v4 = vmul.f32 %v3928_v35, %v3928_v35 }
 0x218   : > { %v2061_v16 = vpop.f32.mrb[25].mxu1  ;;  %v3961_v24 = vadd.f32 %v3960_v6, %v3926_v23  ;;  %v4004_v19 = vmul.f32 %v3926_v23, %v3926_v23  ;;  %v4038_v39 = vadd.f32 %v4037_v18, %v4003_v8  ;;  %3675 = vst [vmem:[%s6289_s22 + $0x88] sm:$0xff] %v4928_v61  ;;  %v3927_v12 = vmul.f32 %v4928_v61, %v6311_v51 }
 0x219   : > { %v4746_v62 = vpop.f32.mrb[26].mxu1  ;;  %v4007_v46 = vmul.f32 %v3929_v59, %v3929_v59 }
 0x21a   : > { %v2064_v55 = vpop.f32.mrb[27].mxu1  ;;  %v4039_v21 = vadd.f32 %v4038_v39, %v4004_v19  ;;  %v3962_v37 = vadd.f32 %v3961_v24, %v3927_v12  ;;  %v4005_v56 = vmul.f32 %v3927_v12, %v3927_v12  ;;  %v4893_v27 = vpop.f32.mrb[20].mxu0 }
 0x21b   : > { %v4929_v26 = vadd.f32 %v4893_v27, %v4741_v1  ;;  %v3559_v50 = vpop.f32.mrb[21].mxu0  ;;  %v3878_v6 = vpop.permute.xlu1 %3877 }
 0x21c   : > { %v3963_v10 = vadd.f32 %v3962_v37, %v3928_v35  ;;  %v4040_v3 = vadd.f32 %v4039_v21, %v4005_v56  ;;  %v4930_v44 = vadd.f32 %v3559_v50, %v2045_v36  ;;  %v4894_v48 = vpop.f32.mrb[22].mxu0 }
 0x21d   : > { %3680 = vst [vmem:[%s6289_s22 + $0xb0] sm:$0xff] %v4929_v26  ;;  %v4931_v51 = vadd.f32 %v4894_v48, %v4742_v60  ;;  %v3562_v47 = vpop.f32.mrb[23].mxu0  ;;  %v3932_v40 = vmul.f32 %v4929_v26, %v3843_v0  ;;  %v3873_v0 = vpop.permute.xlu0 %3872 }
 0x21e   : > { %v4041_v9 = vadd.f32 %v4040_v3, %v4006_v4  ;;  %3678 = vst [vmem:[%s6289_s22 + $0xa0] sm:$0xff] %v4930_v44  ;;  %v3930_v17 = vmul.f32 %v4930_v44, %v6330_v5  ;;  %v3964_v63 = vadd.f32 %v3963_v10, %v3929_v59  ;;  %v4932_v1 = vadd.f32 %v3562_v47, %v2048_v20 }
 0x21f   : > { %v4749_v31 = vpop.f32.mrb[28].mxu1  ;;  %3681 = vst [vmem:[%s6289_s22 + $0xb8] sm:$0xff] %v4931_v51  ;;  %v3933_v14 = vmul.f32 %v4931_v51, %v3848_v58  ;;  %v4010_v52 = vmul.f32 %v3932_v40, %v3932_v40  ;;  %v3888_v44 = vpop.permute.xlu1 %3887 }
 0x220   : > { %v2077_v30 = vpop.f32.mrb[29].mxu1  ;;  %v3965_v43 = vadd.f32 %v3964_v63, %v3930_v17  ;;  %v4008_v36 = vmul.f32 %v3930_v17, %v3930_v17  ;;  %v4042_v38 = vadd.f32 %v4041_v9, %v4007_v46  ;;  %3679 = vst [vmem:[%s6289_s22 + $0xa8] sm:$0xff] %v4932_v1  ;;  %v3931_v60 = vmul.f32 %v4932_v1, %v6335_v54 }
 0x221   : > { %v4750_v57 = vpop.f32.mrb[30].mxu1  ;;  %v4011_v53 = vmul.f32 %v3933_v14, %v3933_v14  ;;  %v3883_v59 = vpop.permute.xlu0 %3882 }
 0x222   : > { %v2080_v32 = vpop.f32.mrb[31].mxu1  ;;  %v4043_v42 = vadd.f32 %v4042_v38, %v4008_v36  ;;  %v3966_v7 = vadd.f32 %v3965_v43, %v3931_v60  ;;  %v4009_v29 = vmul.f32 %v3931_v60, %v3931_v60  ;;  %v4897_v5 = vpop.f32.mrb[24].mxu0 }
 0x223   : > { %v4933_v20 = vadd.f32 %v4897_v5, %v4745_v28  ;;  %v3575_v34 = vpop.f32.mrb[25].mxu0 }
 0x224   : > { %v3967_v11 = vadd.f32 %v3966_v7, %v3932_v40  ;;  %v4044_v22 = vadd.f32 %v4043_v42, %v4009_v29  ;;  %v4934_v33 = vadd.f32 %v3575_v34, %v2061_v16  ;;  %v4898_v2 = vpop.f32.mrb[26].mxu0 }
 0x225   : > { %3684 = vst [vmem:[%s6289_s22 + $0xd0] sm:$0xff] %v4933_v20  ;;  %v4935_v54 = vadd.f32 %v4898_v2, %v4746_v62  ;;  %v3578_v8 = vpop.f32.mrb[27].mxu0  ;;  %v3936_v61 = vmul.f32 %v4933_v20, %v3863_v49 }
 0x226   : > { %v4045_v41 = vadd.f32 %v4044_v22, %v4010_v52  ;;  %3682 = vst [vmem:[%s6289_s22 + $0xc0] sm:$0xff] %v4934_v33  ;;  %v3934_v45 = vmul.f32 %v4934_v33, %v3853_v25  ;;  %v3968_v18 = vadd.f32 %v3967_v11, %v3933_v14  ;;  %v4936_v23 = vadd.f32 %v3578_v8, %v2064_v55 }
 0x227   : > { %v4753_v58 = vpop.f32.mrb[32].mxu1  ;;  %3685 = vst [vmem:[%s6289_s22 + $0xd8] sm:$0xff] %v4935_v54  ;;  %v3937_v62 = vmul.f32 %v4935_v54, %v3868_v15  ;;  %v4014_v26 = vmul.f32 %v3936_v61, %v3936_v61  ;;  %v3898_v15 = vpop.permute.xlu1 %3897 }
 0x228   : > { %v2093_v28 = vpop.f32.mrb[33].mxu1  ;;  %v3969_v24 = vadd.f32 %v3968_v18, %v3934_v45  ;;  %v4012_v19 = vmul.f32 %v3934_v45, %v3934_v45  ;;  %v4046_v16 = vadd.f32 %v4045_v41, %v4011_v53  ;;  %3683 = vst [vmem:[%s6289_s22 + $0xc8] sm:$0xff] %v4936_v23  ;;  %v3935_v39 = vmul.f32 %v4936_v23, %v3858_v13 }
 0x229   : > { %v4754_v35 = vpop.f32.mrb[34].mxu1  ;;  %v4015_v13 = vmul.f32 %v3937_v62, %v3937_v62 }
 0x22a   : > { %v2096_v12 = vpop.f32.mrb[35].mxu1  ;;  %v4047_v21 = vadd.f32 %v4046_v16, %v4012_v19  ;;  %v3970_v37 = vadd.f32 %v3969_v24, %v3935_v39  ;;  %v4013_v25 = vmul.f32 %v3935_v39, %v3935_v39  ;;  %v4901_v56 = vpop.f32.mrb[28].mxu0 }
 0x22b   : > { %v4937_v55 = vadd.f32 %v4901_v56, %v4749_v31  ;;  %v3591_v27 = vpop.f32.mrb[29].mxu0  ;;  %v3893_v31 = vpop.permute.xlu0 %3892 }
 0x22c   : > { %v3971_v50 = vadd.f32 %v3970_v37, %v3936_v61  ;;  %v4048_v4 = vadd.f32 %v4047_v21, %v4013_v25  ;;  %v4938_v10 = vadd.f32 %v3591_v27, %v2077_v30  ;;  %v4902_v3 = vpop.f32.mrb[30].mxu0  ;;  %v3908_v18 = vpop.permute.xlu1 %3907 }
 0x22d   : > { %3688 = vst [vmem:[%s6289_s22 + $0xf0] sm:$0xff] %v4937_v55  ;;  %v4939_v48 = vadd.f32 %v4902_v3, %v4750_v57  ;;  %v3594_v46 = vpop.f32.mrb[31].mxu0  ;;  %v3940_v17 = vmul.f32 %v4937_v55, %v3883_v59 }
 0x22e   : > { %v4049_v51 = vadd.f32 %v4048_v4, %v4014_v26  ;;  %3686 = vst [vmem:[%s6289_s22 + $0xe0] sm:$0xff] %v4938_v10  ;;  %v3938_v47 = vmul.f32 %v4938_v10, %v3873_v0  ;;  %v3972_v49 = vadd.f32 %v3971_v50, %v3937_v62  ;;  %v4940_v9 = vadd.f32 %v3594_v46, %v2080_v32 }
 0x22f   : > { %3689 = vst [vmem:[%s6289_s22 + $0xf8] sm:$0xff] %v4939_v48  ;;  %v3941_v43 = vmul.f32 %v4939_v48, %v3888_v44  ;;  %v4018_v7 = vmul.f32 %v3940_v17, %v3940_v17  ;;  %v3903_v11 = vpop.permute.xlu0 %3902 }
 0x230   : > { %v3973_v63 = vadd.f32 %v3972_v49, %v3938_v47  ;;  %v4016_v1 = vmul.f32 %v3938_v47, %v3938_v47  ;;  %v4050_v40 = vadd.f32 %v4049_v51, %v4015_v13  ;;  %3687 = vst [vmem:[%s6289_s22 + $0xe8] sm:$0xff] %v4940_v9  ;;  %v3939_v30 = vmul.f32 %v4940_v9, %v3878_v6 }
 0x231   : > { %v4019_v34 = vmul.f32 %v3941_v43, %v3941_v43 }
 0x232   : > { %v4051_v36 = vadd.f32 %v4050_v40, %v4016_v1  ;;  %v3974_v38 = vadd.f32 %v3973_v63, %v3939_v30  ;;  %v4017_v60 = vmul.f32 %v3939_v30, %v3939_v30  ;;  %v4905_v57 = vpop.f32.mrb[32].mxu0 }
 0x233   : > { %v4941_v14 = vadd.f32 %v4905_v57, %v4753_v58  ;;  %v3607_v42 = vpop.f32.mrb[33].mxu0 }
 0x234   : > { %v3975_v32 = vadd.f32 %v3974_v38, %v3940_v17  ;;  %v4052_v29 = vadd.f32 %v4051_v36, %v4017_v60  ;;  %v4942_v5 = vadd.f32 %v3607_v42, %v2093_v28  ;;  %v4906_v20 = vpop.f32.mrb[34].mxu0 }
 0x235   : > { %3692 = vst [vmem:[%s6289_s22 + $0x110] sm:$0xff] %v4941_v14  ;;  %v4943_v0 = vadd.f32 %v4906_v20, %v4754_v35  ;;  %v3610_v52 = vpop.f32.mrb[35].mxu0  ;;  %v3944_v54 = vmul.f32 %v4941_v14, %v3903_v11 }
 0x236   : > { %v4053_v22 = vadd.f32 %v4052_v29, %v4018_v7  ;;  %3690 = vst [vmem:[%s6289_s22 + $0x100] sm:$0xff] %v4942_v5  ;;  %v3942_v33 = vmul.f32 %v4942_v5, %v3893_v31  ;;  %v3976_v2 = vadd.f32 %v3975_v32, %v3941_v43  ;;  %v4944_v53 = vadd.f32 %v3610_v52, %v2096_v12 }
 0x237   : > { %3693 = vst [vmem:[%s6289_s22 + $0x118] sm:$0xff] %v4943_v0  ;;  %v3945_v28 = vmul.f32 %v4943_v0, %v3908_v18  ;;  %v4022_v35 = vmul.f32 %v3944_v54, %v3944_v54 }
 0x238   : > { %v3977_v8 = vadd.f32 %v3976_v2, %v3942_v33  ;;  %v4020_v58 = vmul.f32 %v3942_v33, %v3942_v33  ;;  %v4054_v41 = vadd.f32 %v4053_v22, %v4019_v34  ;;  %3691 = vst [vmem:[%s6289_s22 + $0x108] sm:$0xff] %v4944_v53  ;;  %v3943_v45 = vmul.f32 %v4944_v53, %v3898_v15 }
 0x239   : > { %v4023_v16 = vmul.f32 %v3945_v28, %v3945_v28 }
 0x23a   : > { %v4055_v23 = vadd.f32 %v4054_v41, %v4020_v58  ;;  %v3978_v6 = vadd.f32 %v3977_v8, %v3943_v45  ;;  %v4021_v61 = vmul.f32 %v3943_v45, %v3943_v45 }
 0x23c   : > { %v3979_v24 = vadd.f32 %v3978_v6, %v3944_v54  ;;  %v4056_v19 = vadd.f32 %v4055_v23, %v4021_v61 }
 0x23e   : > { %v3980_v39 = vadd.f32 %v3979_v24, %v3945_v28  ;;  %v4057_v62 = vadd.f32 %v4056_v19, %v4022_v35 }
 0x240   : > { %v3981_v12 = vrot.slane %v3980_v39, 4  ;;  %v4058_v59 = vadd.f32 %v4057_v62, %v4023_v16 }
 0x242   : > { %v3982_v21 = vadd.f32 %v3981_v12, %v3980_v39  ;;  %v4059_v37 = vrot.slane %v4058_v59, 4 }
 0x244   : > { %v3983_v25 = vrot.slane %v3982_v21, 2  ;;  %v4060_v56 = vadd.f32 %v4059_v37, %v4058_v59 }
 0x246   : > { %v3984_v55 = vadd.f32 %v3983_v25, %v3982_v21  ;;  %v4061_v27 = vrot.slane %v4060_v56, 2 }
 0x248   : > { %v3985_v26 = vrot.slane %v3984_v55, 1  ;;  %v4062_v50 = vadd.f32 %v4061_v27, %v4060_v56 }
 0x24a   : > { %v3986_v4 = vadd.f32 %v3985_v26, %v3984_v55  ;;  %v4063_v10 = vrot.slane %v4062_v50, 1 }
 0x24c   : > { %3987 = vst [vmem:[%s208_s26] sm:$0x1] %v3986_v4  ;;  %v4064_v3 = vadd.f32 %v4063_v10, %v4062_v50 }
 0x24e   : > { %4065 = vst [vmem:[%s208_s26 + $0x1] sm:$0x1] %v4064_v3 }
 0x24f PF: > { %s15_s15 = sadd.s32 1, %s5299_s15  }
 0x250   : > { %p12_p4 = scmp.ge.s32.totalorder %s15_s15, 4  }
 0x252   :  { %14 = sbr.rel (!%p12_p4) target bundleno = 1 (0x1), region = 82 }

</bundles_post_ra>
